<compile_context>
chip_gen: v7x
topology: tpu7x:2x2x1
jax: 0.10.0
libtpu: 0.0.40
codegen_flags: <defaults>
</compile_context>

<pallas_src>
import jax
import jax.numpy as jnp
from jax import lax
from jax.experimental import pallas as pl
from jax.experimental.pallas import tpu as pltpu

# ---------------- configuration (small, deterministic) ----------------
B = 8           # batch size
L = 8           # sequence length (iupac / selfies)
VOCAB = 64      # vocab size for selfies / iupac stubs
H = 32          # hidden width (iupac_width == selfies_width == fusion width)
MOL_N = 6       # number of graph nodes (stub)
MOL_F = 16      # raw node-feature width (stub)
MOL_W = 32      # mol_width (must equal H for the stacked block-diagonal projection)
D = 128         # embed_dim (contrastive space)
Q = 24          # quene_size (Q % B == 0)
TEMP = 0.07
MOMENTUM = 0.995
MSM_PRO = 0.15
ALPHA = 0.4

VMEM = pltpu.MemorySpace.VMEM
SMEM = pltpu.MemorySpace.SMEM


# =====================  Pallas kernels  =====================

def _dot_nt(a, b):
    """a (M, K) contracted with b (N, K) -> (M, N); f32 accumulation on the MXU."""
    return lax.dot_general(a, b, dimension_numbers=(((1,), (1,)), ((), ())),
                           preferred_element_type=jnp.float32)


def _fused_sima_kernel(xin_ref, w_ref, q_ref, scal_ref,
                       loss_ref, sim_ref, feats_ref):
    """One kernel: 6 projections + L2-normalize, 12 sims (3 matmuls), 6 CE losses.

    xin_ref : (6B, 6H+6)  block-diagonal pooled inputs + bias-selector columns.
              Row blocks: [s, s_m, i, m, i_m, m_m].
    w_ref   : (6H+6, D)   stacked proj weights + stacked bias rows.
    q_ref   : (3Q, D)     stacked queues [selfies; iupac; mol], row-major.
    scal_ref: SMEM (2,)   [1/temp, alpha].
    """
    inv_temp = scal_ref[0]
    alpha = scal_ref[1]

    bsz = xin_ref.shape[0] // 6
    qn = q_ref.shape[0] // 3

    # ---- single block-diagonal matmul == 6 x (proj + bias); one rsqrt normalize ----
    y = jnp.dot(xin_ref[...], w_ref[...], preferred_element_type=jnp.float32)
    ss = jnp.sum(y * y, axis=1, keepdims=True)
    feats = y * lax.rsqrt(jnp.maximum(ss, 1e-24))          # (6B, D) unit rows
    feats_ref[...] = feats
    # row blocks: [s_feat; s_feat_m; i_feat; m_feat; i_feat_m; m_feat_m]

    q = q_ref[...]
    # x_feat_all^T as rows: [x_feat_m ; x_queue]  -> (N, D), N = B + Q
    s_rows = jnp.concatenate([feats[bsz:2 * bsz],     q[:qn]],          axis=0)
    i_rows = jnp.concatenate([feats[4 * bsz:5 * bsz], q[qn:2 * qn]],    axis=0)
    m_rows = jnp.concatenate([feats[5 * bsz:6 * bsz], q[2 * qn:3 * qn]], axis=0)

    lhs_s = feats[0:2 * bsz]         # [s_feat; s_feat_m]        (contiguous slice)
    lhs_a = feats[2 * bsz:6 * bsz]   # [i; m; i_m; m_m]           (contiguous slice)

    # ---- three MXU dots cover all 12 similarity matrices (dot linearity) ----
    sa = _dot_nt(lhs_a, s_rows) * inv_temp   # (4B, N): [i2s; m2s; i2s_m; m2s_m]
    si = _dot_nt(lhs_s, i_rows) * inv_temp   # (2B, N): [s2i; s2i_m]
    sm = _dot_nt(lhs_s, m_rows) * inv_temp   # (2B, N): [s2m; s2m_m]

    i2s, m2s = sa[:bsz], sa[bsz:2 * bsz]
    i2s_m, m2s_m = sa[2 * bsz:3 * bsz], sa[3 * bsz:4 * bsz]
    s2i, s2i_m = si[:bsz], si[bsz:]
    s2m, s2m_m = sm[:bsz], sm[bsz:]
    s2im, s2im_m = s2i + s2m, s2i_m + s2m_m
    im2s, im2s_m = i2s + m2s, i2s_m + m2s_m

    # lane-dense packed output [sim_s2im | sim_im2s] -> split in the wrapper
    sim_ref[...] = jnp.concatenate([s2im, im2s], axis=1)   # (B, 2N)

    # diagonal mask built once, reused by all six pairs (no (6B,N) targets array)
    n = bsz + qn
    r = lax.broadcasted_iota(jnp.int32, (bsz, n), 0)
    c = lax.broadcasted_iota(jnp.int32, (bsz, n), 1)
    diag = (r == c).astype(jnp.float32)

    def pair(sim, sim_m):
        # soft targets: exact softmax of the momentum sims
        mmax = jnp.max(sim_m, axis=1, keepdims=True)
        e = jnp.exp(sim_m - mmax)
        soft = e / jnp.sum(e, axis=1, keepdims=True)
        # log-softmax of the grad-path sims
        mx = jnp.max(sim, axis=1, keepdims=True)
        lse = jnp.log(jnp.sum(jnp.exp(sim - mx), axis=1, keepdims=True)) + mx
        logp = sim - lse
        # target = alpha*soft + (1-alpha)*eye, folded directly into the row loss
        row = (alpha * jnp.sum(logp * soft, axis=1, keepdims=True)
               + (1.0 - alpha) * jnp.sum(logp * diag, axis=1, keepdims=True))
        return jnp.sum(row, axis=0, keepdims=True)          # (1, 1)

    total = (pair(s2i, s2i_m) + pair(i2s, i2s_m)
             + pair(s2m, s2m_m) + pair(m2s, m2s_m)
             + pair(s2im, s2im_m) + pair(im2s, im2s_m))
    # ((l1+l2)/2 + (l3+l4)/2 + (l5+l6)/2)/3 == sum(all rows)/(6*B); CE is -sum(logp*t)
    loss_ref[...] = -total * (1.0 / (6.0 * bsz))


def fused_sima_losses(params, params_m, queues,
                      s_cls, i_cls, m_pool, s_cls_m, i_cls_m, m_pool_m,
                      temp, alpha):
    # TODO(synk): the stacked block-diagonal projection assumes mol_width == hidden
    # width; pad the narrower inputs/weights to the max width if they ever differ.
    pooled = jnp.stack(
        [s_cls, s_cls_m, i_cls, m_pool, i_cls_m, m_pool_m], axis=0
    ).astype(jnp.float32)                                              # (6, B, H)
    nb, bsz, h = pooled.shape
    eye6 = jnp.eye(nb, dtype=jnp.float32)
    blk = (pooled[:, :, None, :] * eye6[:, None, :, None]).reshape(nb * bsz, nb * h)
    ones_col = jnp.repeat(eye6, bsz, axis=0)                           # bias selector (6B, 6)
    xin = jnp.concatenate([blk, ones_col], axis=1)                     # (6B, 6H+6)

    w_aug = jnp.concatenate([
        params["selfies_proj"]["w"],   params_m["selfies_proj"]["w"],
        params["iupac_proj"]["w"],     params["mol_proj"]["w"],
        params_m["iupac_proj"]["w"],   params_m["mol_proj"]["w"],
        params["selfies_proj"]["b"][None, :],   params_m["selfies_proj"]["b"][None, :],
        params["iupac_proj"]["b"][None, :],     params["mol_proj"]["b"][None, :],
        params_m["iupac_proj"]["b"][None, :],   params_m["mol_proj"]["b"][None, :],
    ], axis=0).astype(jnp.float32)                                     # (6H+6, D)

    qstack = jnp.concatenate(
        [queues["selfies"], queues["iupac"], queues["mol"]], axis=0
    ).astype(jnp.float32)                                              # (3Q, D)

    scal = jnp.stack([1.0 / temp, jnp.asarray(alpha, jnp.float32)]).astype(jnp.float32)

    n_all = bsz + queues["selfies"].shape[0]
    vspec = pl.BlockSpec(memory_space=VMEM)
    return pl.pallas_call(
        _fused_sima_kernel,
        out_shape=(jax.ShapeDtypeStruct((1, 1), jnp.float32),            # loss_sima
                   jax.ShapeDtypeStruct((bsz, 2 * n_all), jnp.float32),  # [s2im | im2s]
                   jax.ShapeDtypeStruct((nb * bsz, D), jnp.float32)),    # normalized feats
        in_specs=[vspec, vspec, vspec, pl.BlockSpec(memory_space=SMEM)],
        out_specs=(vspec, vspec, vspec),
    )(xin, w_aug, qstack, scal)


def _heads_kernel(xsim_ref, wdiff_ref, xmsm_ref, wv_ref, bv_ref, labels_ref,
                  scal_ref, loss_ref):
    """Fused sim_head binary CE + masked-selfies-modeling CE (one launch)."""
    # --- sim_head CE: labels are [1]*bs + [0]*(2*bs); softplus form on the VPU ---
    d = jnp.sum(xsim_ref[...] * wdiff_ref[...], axis=1, keepdims=True) + scal_ref[0]
    n_rows = xsim_ref.shape[0]
    bs = n_rows // 3
    rows = lax.broadcasted_iota(jnp.int32, (n_rows, 1), 0)
    sign = jnp.where(rows < bs, -1.0, 1.0)
    z = sign * d
    sp = jnp.maximum(z, 0.0) + jnp.log(1.0 + jnp.exp(-jnp.abs(z)))
    loss_simm = jnp.sum(sp, axis=0, keepdims=True) * (1.0 / n_rows)    # (1, 1)

    # --- masked-LM CE: NLL against int labels (label 0 == ignore) ---
    # TODO(synk): BertForMaskSM is external; label==0 ignore matches mask() setting
    # targets[~masked]=0 (masked positions never have token id 0/1).
    # TODO(synk): for a realistic VOCAB (>=30k) this should be gridded over vocab
    # tiles with an online max/LSE accumulator to stay under v7x's 64 MiB VMEM.
    logits = jnp.dot(xmsm_ref[...], wv_ref[...],
                     preferred_element_type=jnp.float32) + bv_ref[...]
    mx = jnp.max(logits, axis=1, keepdims=True)
    lse = jnp.log(jnp.sum(jnp.exp(logits - mx), axis=1, keepdims=True)) + mx
    logp = logits - lse
    labels = labels_ref[...]                                   # (N, 1) int32
    cols = lax.broadcasted_iota(jnp.int32, logits.shape, 1)
    pick = (cols == labels).astype(jnp.float32)
    nll = -jnp.sum(logp * pick, axis=1, keepdims=True)
    valid = (labels != 0).astype(jnp.float32)
    total = jnp.sum(nll * valid, axis=0, keepdims=True)
    count = jnp.maximum(jnp.sum(valid, axis=0, keepdims=True), 1.0)
    loss_msm = total / count                                           # (1, 1)

    loss_ref[...] = jnp.concatenate([loss_simm, loss_msm], axis=1)     # (1, 2)


def fused_head_losses(sim_emb, sim_head, msm_x, msm_head, msm_labels):
    wdiff = (sim_head["w"][:, 1] - sim_head["w"][:, 0]).reshape(1, -1)
    bdiff = (sim_head["b"][1] - sim_head["b"][0]).reshape(1).astype(jnp.float32)
    n = msm_x.shape[0]
    out = pl.pallas_call(
        _heads_kernel,
        out_shape=jax.ShapeDtypeStruct((1, 2), jnp.float32),
        in_specs=[pl.BlockSpec(memory_space=VMEM)] * 6
                 + [pl.BlockSpec(memory_space=SMEM)],
        out_specs=pl.BlockSpec(memory_space=VMEM),
    )(sim_emb.astype(jnp.float32), wdiff,
      msm_x.astype(jnp.float32), msm_head["w"], msm_head["b"].reshape(1, -1),
      msm_labels.reshape(n, 1).astype(jnp.int32), bdiff)
    return out[0, 0], out[0, 1]


# =====================  stub encoders (plain-JAX glue)  =====================
# TODO(synk): GNN_graphpred / bert_encoder / fusion_encoder / BertForMaskSM are
# external modules whose definitions are not provided; deterministic small
# stand-ins with the correct interfaces are used instead.

def bert_encoder_stub(emb_table, ids):
    embeds = jnp.take(emb_table, ids, axis=0)          # (B, L, H)
    mask = (ids != 0).astype(jnp.float32)              # (B, L)
    return embeds, mask


def gnn_encoder_stub(p, mol):
    node_h = jnp.tanh(mol @ p["w"] + p["b"])           # (B, MOL_N, MOL_W)
    pool = jnp.mean(node_h, axis=1)                    # (B, MOL_W)
    mask = jnp.ones(node_h.shape[:2], jnp.float32)     # (B, MOL_N)
    return pool, node_h, mask


def fusion_encoder_stub(params, s_emb, im_emb, s_mask, im_mask):
    im_m = im_mask[..., None]
    pooled = jnp.sum(im_emb * im_m, axis=1) / jnp.maximum(jnp.sum(im_m, axis=1), 1.0)
    out = jnp.tanh(s_emb @ params["fusion_w1"]["w"] + params["fusion_w1"]["b"]
                   + (pooled @ params["fusion_w2"]["w"]
                      + params["fusion_w2"]["b"])[:, None, :])
    return out  # (batch, L_selfies, H)


# =====================  parameter / state init  =====================

def _lin(key, din, dout):
    kw, kb = jax.random.split(key)
    return {"w": 0.02 * jax.random.normal(kw, (din, dout), jnp.float32),
            "b": 0.02 * jax.random.normal(kb, (dout,), jnp.float32)}


def init_params(key):
    ks = jax.random.split(key, 10)
    return {
        "selfies_emb": 0.02 * jax.random.normal(ks[0], (VOCAB, H), jnp.float32),
        "iupac_emb":   0.02 * jax.random.normal(ks[1], (VOCAB, H), jnp.float32),
        "gnn":         _lin(ks[2], MOL_F, MOL_W),
        "selfies_proj": _lin(ks[3], H, D),
        "iupac_proj":   _lin(ks[4], H, D),
        "mol_proj":     _lin(ks[5], MOL_W, D),
        "fusion_w1":    _lin(ks[6], H, H),
        "fusion_w2":    _lin(ks[7], H, H),
        "sim_head":     _lin(ks[8], H, 2),
        "msm_head":     _lin(ks[9], H, VOCAB),
    }


def init_queues(key):
    # Queues stored row-major (Q, D): feature axis on lanes, no transposes needed.
    ks = jax.random.split(key, 3)

    def q(k):
        x = jax.random.normal(k, (Q, D), jnp.float32)
        return x / jnp.maximum(jnp.linalg.norm(x, axis=1, keepdims=True), 1e-12)

    return {"selfies": q(ks[0]), "iupac": q(ks[1]), "mol": q(ks[2]),
            "ptr": jnp.zeros((), jnp.int32)}


# =====================  TMMF forward  =====================

def tmmf_forward(params, params_m, queues, mol, iupac, selfies, key, alpha=ALPHA):
    temp = jnp.clip(jnp.asarray(TEMP, jnp.float32), 0.001, 0.5)

    # ---- online encoders (stubs) ----
    iupac_embeds, iupac_mask = bert_encoder_stub(params["iupac_emb"], iupac)
    selfies_embeds, selfies_mask = bert_encoder_stub(params["selfies_emb"], selfies)
    mol_pool, mol_embeds, mol_mask = gnn_encoder_stub(params["gnn"], mol)

    # ---- momentum update + momentum encoders (stubs) ----
    params_m = jax.tree_util.tree_map(
        lambda pm, p: pm * MOMENTUM + p * (1.0 - MOMENTUM), params_m, params)
    iupac_embeds_m, _ = bert_encoder_stub(params_m["iupac_emb"], iupac)
    selfies_embeds_m, _ = bert_encoder_stub(params_m["selfies_emb"], selfies)
    mol_pool_m, _, _ = gnn_encoder_stub(params_m["gnn"], mol)

    # ---- single fused Pallas kernel: 6x proj+normalize, 12 sims, 6 CE losses ----
    loss_sima_11, sim_pack, feats = fused_sima_losses(
        params, params_m, queues,
        selfies_embeds[:, 0, :], iupac_embeds[:, 0, :], mol_pool,
        selfies_embeds_m[:, 0, :], iupac_embeds_m[:, 0, :], mol_pool_m,
        temp, alpha)
    loss_sima = loss_sima_11[0, 0]

    n_all = B + Q
    sim_s2im = sim_pack[:, :n_all]
    sim_im2s = sim_pack[:, n_all:]
    selfies_feat_m = feats[B:2 * B]
    iupac_feat_m = feats[4 * B:5 * B]
    mol_feat_m = feats[5 * B:6 * B]

    # ---- dequeue & enqueue (queues are (Q, D): no transposes) ----
    ptr = queues["ptr"]
    new_queues = {
        "selfies": lax.dynamic_update_slice(queues["selfies"], selfies_feat_m, (ptr, 0)),
        "iupac":   lax.dynamic_update_slice(queues["iupac"],   iupac_feat_m,   (ptr, 0)),
        "mol":     lax.dynamic_update_slice(queues["mol"],     mol_feat_m,     (ptr, 0)),
        "ptr": (ptr + B) % Q,
    }

    # ---- fusion positives / hard-negative mining ----
    iupac_mol_embeds = jnp.concatenate([iupac_embeds, mol_embeds], axis=1)
    iupac_mol_mask = jnp.concatenate([iupac_mask, mol_mask], axis=1)
    output_pos = fusion_encoder_stub(params, selfies_embeds, iupac_mol_embeds,
                                     selfies_mask, iupac_mol_mask)

    bs = selfies.shape[0]
    eye = jnp.eye(bs, dtype=jnp.float32)
    weights_s2im = jax.nn.softmax(sim_s2im[:, :bs] + 1e-4, axis=1) * (1.0 - eye)
    weights_im2s = jax.nn.softmax(sim_im2s[:, :bs] + 1e-4, axis=1) * (1.0 - eye)
    # TODO(synk): torch.multinomial replaced by deterministic categorical draws.
    k1, k2, k3, k4, k5, k6 = jax.random.split(key, 6)
    neg_idx_im = jax.random.categorical(
        k1, jnp.where(weights_s2im > 0, jnp.log(weights_s2im), -jnp.inf), axis=1)
    neg_idx_s = jax.random.categorical(
        k2, jnp.where(weights_im2s > 0, jnp.log(weights_im2s), -jnp.inf), axis=1)

    iupac_mol_embeds_neg = iupac_mol_embeds[neg_idx_im]
    iupac_mol_mask_neg = iupac_mol_mask[neg_idx_im]
    selfies_embeds_neg = selfies_embeds[neg_idx_s]
    selfies_mask_neg = selfies_mask[neg_idx_s]

    selfies_embeds_all = jnp.concatenate([selfies_embeds, selfies_embeds_neg], axis=0)
    selfies_mask_all = jnp.concatenate([selfies_mask, selfies_mask_neg], axis=0)
    iupac_mol_embeds_all = jnp.concatenate([iupac_mol_embeds_neg, iupac_mol_embeds], axis=0)
    iupac_mol_mask_all = jnp.concatenate([iupac_mol_mask_neg, iupac_mol_mask], axis=0)
    output_neg = fusion_encoder_stub(params, selfies_embeds_all, iupac_mol_embeds_all,
                                     selfies_mask_all, iupac_mol_mask_all)

    sim_embeddings = jnp.concatenate([output_pos[:, 0, :], output_neg[:, 0, :]], axis=0)

    # ---- masked selfies modeling (mask() + BertForMaskSM stub) ----
    masked = jax.random.bernoulli(k3, MSM_PRO, selfies.shape)
    masked = masked & (selfies != 0) & (selfies != 1)
    labels = jnp.where(masked, selfies, 0)
    replaced = jax.random.bernoulli(k4, 0.8, selfies.shape) & masked
    input_ids = jnp.where(replaced, 2, selfies)
    rand_pos = jax.random.bernoulli(k5, 0.5, selfies.shape) & masked & (~replaced)
    rand_words = jax.random.randint(k6, selfies.shape, 0, VOCAB)
    input_ids = jnp.where(rand_pos, rand_words, input_ids)

    m_embeds, m_mask = bert_encoder_stub(params["selfies_emb"], input_ids)
    out = fusion_encoder_stub(params, m_embeds, iupac_mol_embeds, m_mask, iupac_mol_mask)
    flat = out.reshape(-1, H)
    flat_labels = labels.reshape(-1)

    # ---- one fused Pallas kernel for sim_head CE + masked-LM CE ----
    loss_simm, loss_msm = fused_head_losses(
        sim_embeddings, params["sim_head"], flat, params["msm_head"], flat_labels)

    return (out, loss_sima, loss_simm, loss_msm), params_m, new_queues


# =====================  main  =====================

if __name__ == "__main__":
    root = jax.random.PRNGKey(0)
    k_par, k_q, k_mol, k_iu, k_se, k_fwd = jax.random.split(root, 6)

    params = init_params(k_par)
    params_m = jax.tree_util.tree_map(lambda x: x, params)   # copy_params()
    queues = init_queues(k_q)

    mol = jax.random.normal(k_mol, (B, MOL_N, MOL_F), jnp.float32)
    iupac = jax.random.randint(k_iu, (B, L), 2, VOCAB, dtype=jnp.int32)
    selfies = jax.random.randint(k_se, (B, L), 2, VOCAB, dtype=jnp.int32)

    fwd = jax.jit(tmmf_forward)
    (out, loss_sima, loss_simm, loss_msm), params_m, queues = fwd(
        params, params_m, queues, mol, iupac, selfies, k_fwd)

    jax.block_until_ready((out, loss_sima, loss_simm, loss_msm))
    assert out.shape == (B, L, H)
    assert jnp.isfinite(loss_sima) and jnp.isfinite(loss_simm) and jnp.isfinite(loss_msm)
    print("KERNEL_OK")
</pallas_src>

<mosaic_0001>
module attributes {stable_mosaic.version = 11 : i64} {
  func.func @_fused_sima_kernel(%arg0: memref<48x198xf32, #tpu.memory_space<vmem>>, %arg1: memref<198x128xf32, #tpu.memory_space<vmem>>, %arg2: memref<72x128xf32, #tpu.memory_space<vmem>>, %arg3: memref<2xf32, #tpu.memory_space<smem>>, %arg4: memref<1x1xf32, #tpu.memory_space<vmem>>, %arg5: memref<8x64xf32, #tpu.memory_space<vmem>>, %arg6: memref<48x128xf32, #tpu.memory_space<vmem>>) attributes {dimension_semantics = [], scalar_prefetch = 0 : i64, scratch_operands = 0 : i64, tpu.core_type = #tpu.core_type<tc>} {
    %c0 = arith.constant 0 : index
    %0 = memref.load %arg3[%c0] : memref<2xf32, #tpu.memory_space<smem>>
    %c1 = arith.constant 1 : index
    %1 = memref.load %arg3[%c1] : memref<2xf32, #tpu.memory_space<smem>>
    %c0_0 = arith.constant 0 : index
    %c0_1 = arith.constant 0 : index
    %2 = vector.load %arg0[%c0_0, %c0_1] : memref<48x198xf32, #tpu.memory_space<vmem>>, vector<48x198xf32>
    %c0_2 = arith.constant 0 : index
    %c0_3 = arith.constant 0 : index
    %3 = vector.load %arg1[%c0_2, %c0_3] : memref<198x128xf32, #tpu.memory_space<vmem>>, vector<198x128xf32>
    %cst = arith.constant dense<0.000000e+00> : vector<48x128xf32>
    %4 = tpu.matmul %2, %3, %cst {dimension_numbers = #tpu.dot_dimension_numbers<[1], [0], [0], [1], [0, 0, 1, 1], [], []>} : vector<48x198xf32>, vector<198x128xf32>, vector<48x128xf32> -> vector<48x128xf32>
    %5 = arith.mulf %4, %4 : vector<48x128xf32>
    %cst_4 = arith.constant dense<0.000000e+00> : vector<48xf32>
    %6 = vector.multi_reduction <add>, %5, %cst_4 [1] : vector<48x128xf32> to vector<48xf32>
    %7 = vector.shape_cast %6 : vector<48xf32> to vector<48x1xf32>
    %cst_5 = arith.constant 1.000000e-24 : f32
    %8 = vector.broadcast %cst_5 : f32 to vector<48x1xf32>
    %9 = arith.maximumf %7, %8 : vector<48x1xf32>
    %10 = math.rsqrt %9 : vector<48x1xf32>
    %11 = vector.broadcast %10 : vector<48x1xf32> to vector<48x128xf32>
    %12 = arith.mulf %4, %11 : vector<48x128xf32>
    %c0_6 = arith.constant 0 : index
    %c0_7 = arith.constant 0 : index
    %13 = vector.load %arg6[%c0_6, %c0_7] : memref<48x128xf32, #tpu.memory_space<vmem>>, vector<48x128xf32>
    tpu.vector_store %arg6[%c0_6, %c0_7], %12 {strides = array<i32>} : memref<48x128xf32, #tpu.memory_space<vmem>>, vector<48x128xf32>,
    %c0_8 = arith.constant 0 : index
    %c0_9 = arith.constant 0 : index
    %14 = vector.load %arg2[%c0_8, %c0_9] : memref<72x128xf32, #tpu.memory_space<vmem>>, vector<72x128xf32>
    %15 = vector.extract_strided_slice %12 {offsets = [8, 0], sizes = [8, 128], strides = [1, 1]} : vector<48x128xf32> to vector<8x128xf32>
    %16 = vector.extract_strided_slice %14 {offsets = [0, 0], sizes = [24, 128], strides = [1, 1]} : vector<72x128xf32> to vector<24x128xf32>
    %17 = tpu.concatenate %15, %16 in 0 : vector<8x128xf32>, vector<24x128xf32> -> vector<32x128xf32>
    %18 = vector.extract_strided_slice %12 {offsets = [32, 0], sizes = [8, 128], strides = [1, 1]} : vector<48x128xf32> to vector<8x128xf32>
    %19 = vector.extract_strided_slice %14 {offsets = [24, 0], sizes = [24, 128], strides = [1, 1]} : vector<72x128xf32> to vector<24x128xf32>
    %20 = tpu.concatenate %18, %19 in 0 : vector<8x128xf32>, vector<24x128xf32> -> vector<32x128xf32>
    %21 = vector.extract_strided_slice %12 {offsets = [40, 0], sizes = [8, 128], strides = [1, 1]} : vector<48x128xf32> to vector<8x128xf32>
    %22 = vector.extract_strided_slice %14 {offsets = [48, 0], sizes = [24, 128], strides = [1, 1]} : vector<72x128xf32> to vector<24x128xf32>
    %23 = tpu.concatenate %21, %22 in 0 : vector<8x128xf32>, vector<24x128xf32> -> vector<32x128xf32>
    %24 = vector.extract_strided_slice %12 {offsets = [0, 0], sizes = [16, 128], strides = [1, 1]} : vector<48x128xf32> to vector<16x128xf32>
    %25 = vector.extract_strided_slice %12 {offsets = [16, 0], sizes = [32, 128], strides = [1, 1]} : vector<48x128xf32> to vector<32x128xf32>
    %cst_10 = arith.constant dense<0.000000e+00> : vector<32x32xf32>
    %26 = tpu.matmul %25, %17, %cst_10 {dimension_numbers = #tpu.dot_dimension_numbers<[1], [1], [0], [0], [0, 0, 1, 0], [], []>} : vector<32x128xf32>, vector<32x128xf32>, vector<32x32xf32> -> vector<32x32xf32>
    %27 = vector.broadcast %0 : f32 to vector<32x32xf32>
    %28 = arith.mulf %26, %27 : vector<32x32xf32>
    %cst_11 = arith.constant dense<0.000000e+00> : vector<16x32xf32>
    %29 = tpu.matmul %24, %20, %cst_11 {dimension_numbers = #tpu.dot_dimension_numbers<[1], [1], [0], [0], [0, 0, 1, 0], [], []>} : vector<16x128xf32>, vector<32x128xf32>, vector<16x32xf32> -> vector<16x32xf32>
    %30 = vector.broadcast %0 : f32 to vector<16x32xf32>
    %31 = arith.mulf %29, %30 : vector<16x32xf32>
    %cst_12 = arith.constant dense<0.000000e+00> : vector<16x32xf32>
    %32 = tpu.matmul %24, %23, %cst_12 {dimension_numbers = #tpu.dot_dimension_numbers<[1], [1], [0], [0], [0, 0, 1, 0], [], []>} : vector<16x128xf32>, vector<32x128xf32>, vector<16x32xf32> -> vector<16x32xf32>
    %33 = vector.broadcast %0 : f32 to vector<16x32xf32>
    %34 = arith.mulf %32, %33 : vector<16x32xf32>
    %35 = vector.extract_strided_slice %28 {offsets = [0, 0], sizes = [8, 32], strides = [1, 1]} : vector<32x32xf32> to vector<8x32xf32>
    %36 = vector.extract_strided_slice %28 {offsets = [8, 0], sizes = [8, 32], strides = [1, 1]} : vector<32x32xf32> to vector<8x32xf32>
    %37 = vector.extract_strided_slice %28 {offsets = [16, 0], sizes = [8, 32], strides = [1, 1]} : vector<32x32xf32> to vector<8x32xf32>
    %38 = vector.extract_strided_slice %28 {offsets = [24, 0], sizes = [8, 32], strides = [1, 1]} : vector<32x32xf32> to vector<8x32xf32>
    %39 = vector.extract_strided_slice %31 {offsets = [0, 0], sizes = [8, 32], strides = [1, 1]} : vector<16x32xf32> to vector<8x32xf32>
    %40 = vector.extract_strided_slice %31 {offsets = [8, 0], sizes = [8, 32], strides = [1, 1]} : vector<16x32xf32> to vector<8x32xf32>
    %41 = vector.extract_strided_slice %34 {offsets = [0, 0], sizes = [8, 32], strides = [1, 1]} : vector<16x32xf32> to vector<8x32xf32>
    %42 = vector.extract_strided_slice %34 {offsets = [8, 0], sizes = [8, 32], strides = [1, 1]} : vector<16x32xf32> to vector<8x32xf32>
    %43 = arith.addf %39, %41 : vector<8x32xf32>
    %44 = arith.addf %40, %42 : vector<8x32xf32>
    %45 = arith.addf %35, %36 : vector<8x32xf32>
    %46 = arith.addf %37, %38 : vector<8x32xf32>
    %47 = tpu.concatenate %43, %45 in 1 : vector<8x32xf32>, vector<8x32xf32> -> vector<8x64xf32>
    %c0_13 = arith.constant 0 : index
    %c0_14 = arith.constant 0 : index
    %48 = vector.load %arg5[%c0_13, %c0_14] : memref<8x64xf32, #tpu.memory_space<vmem>>, vector<8x64xf32>
    tpu.vector_store %arg5[%c0_13, %c0_14], %47 {strides = array<i32>} : memref<8x64xf32, #tpu.memory_space<vmem>>, vector<8x64xf32>,
    %49 = tpu.iota {dimensions = array<i32: 0>} : vector<8x32xi32>
    %50 = tpu.iota {dimensions = array<i32: 1>} : vector<8x32xi32>
    %51 = arith.cmpi eq, %49, %50 : vector<8x32xi32>
    %52 = arith.extui %51 : vector<8x32xi1> to vector<8x32xi32>
    %53 = arith.sitofp %52 : vector<8x32xi32> to vector<8x32xf32>
    %cst_15 = arith.constant dense<0xFF800000> : vector<8xf32>
    %54 = vector.multi_reduction <maximumf>, %40, %cst_15 [1] : vector<8x32xf32> to vector<8xf32>
    %55 = vector.shape_cast %54 : vector<8xf32> to vector<8x1xf32>
    %56 = vector.broadcast %55 : vector<8x1xf32> to vector<8x32xf32>
    %57 = arith.subf %40, %56 : vector<8x32xf32>
    %58 = math.exp %57 : vector<8x32xf32>
    %cst_16 = arith.constant dense<0.000000e+00> : vector<8xf32>
    %59 = vector.multi_reduction <add>, %58, %cst_16 [1] : vector<8x32xf32> to vector<8xf32>
    %60 = vector.shape_cast %59 : vector<8xf32> to vector<8x1xf32>
    %61 = vector.broadcast %60 : vector<8x1xf32> to vector<8x32xf32>
    %62 = arith.divf %58, %61 : vector<8x32xf32>
    %cst_17 = arith.constant dense<0xFF800000> : vector<8xf32>
    %63 = vector.multi_reduction <maximumf>, %39, %cst_17 [1] : vector<8x32xf32> to vector<8xf32>
    %64 = vector.shape_cast %63 : vector<8xf32> to vector<8x1xf32>
    %65 = vector.broadcast %64 : vector<8x1xf32> to vector<8x32xf32>
    %66 = arith.subf %39, %65 : vector<8x32xf32>
    %67 = math.exp %66 : vector<8x32xf32>
    %cst_18 = arith.constant dense<0.000000e+00> : vector<8xf32>
    %68 = vector.multi_reduction <add>, %67, %cst_18 [1] : vector<8x32xf32> to vector<8xf32>
    %69 = vector.shape_cast %68 : vector<8xf32> to vector<8x1xf32>
    %70 = math.log %69 : vector<8x1xf32>
    %71 = arith.addf %70, %64 : vector<8x1xf32>
    %72 = vector.broadcast %71 : vector<8x1xf32> to vector<8x32xf32>
    %73 = arith.subf %39, %72 : vector<8x32xf32>
    %74 = arith.mulf %73, %62 : vector<8x32xf32>
    %cst_19 = arith.constant dense<0.000000e+00> : vector<8xf32>
    %75 = vector.multi_reduction <add>, %74, %cst_19 [1] : vector<8x32xf32> to vector<8xf32>
    %76 = vector.shape_cast %75 : vector<8xf32> to vector<8x1xf32>
    %77 = vector.broadcast %1 : f32 to vector<8x1xf32>
    %78 = arith.mulf %77, %76 : vector<8x1xf32>
    %cst_20 = arith.constant 1.000000e+00 : f32
    %79 = arith.subf %cst_20, %1 : f32
    %80 = arith.mulf %73, %53 : vector<8x32xf32>
    %cst_21 = arith.constant dense<0.000000e+00> : vector<8xf32>
    %81 = vector.multi_reduction <add>, %80, %cst_21 [1] : vector<8x32xf32> to vector<8xf32>
    %82 = vector.shape_cast %81 : vector<8xf32> to vector<8x1xf32>
    %83 = vector.broadcast %79 : f32 to vector<8x1xf32>
    %84 = arith.mulf %83, %82 : vector<8x1xf32>
    %85 = arith.addf %78, %84 : vector<8x1xf32>
    %cst_22 = arith.constant dense<0.000000e+00> : vector<1xf32>
    %86 = vector.multi_reduction <add>, %85, %cst_22 [0] : vector<8x1xf32> to vector<1xf32>
    %87 = vector.shape_cast %86 : vector<1xf32> to vector<1x1xf32>
    %cst_23 = arith.constant dense<0xFF800000> : vector<8xf32>
    %88 = vector.multi_reduction <maximumf>, %37, %cst_23 [1] : vector<8x32xf32> to vector<8xf32>
    %89 = vector.shape_cast %88 : vector<8xf32> to vector<8x1xf32>
    %90 = vector.broadcast %89 : vector<8x1xf32> to vector<8x32xf32>
    %91 = arith.subf %37, %90 : vector<8x32xf32>
    %92 = math.exp %91 : vector<8x32xf32>
    %cst_24 = arith.constant dense<0.000000e+00> : vector<8xf32>
    %93 = vector.multi_reduction <add>, %92, %cst_24 [1] : vector<8x32xf32> to vector<8xf32>
    %94 = vector.shape_cast %93 : vector<8xf32> to vector<8x1xf32>
    %95 = vector.broadcast %94 : vector<8x1xf32> to vector<8x32xf32>
    %96 = arith.divf %92, %95 : vector<8x32xf32>
    %cst_25 = arith.constant dense<0xFF800000> : vector<8xf32>
    %97 = vector.multi_reduction <maximumf>, %35, %cst_25 [1] : vector<8x32xf32> to vector<8xf32>
    %98 = vector.shape_cast %97 : vector<8xf32> to vector<8x1xf32>
    %99 = vector.broadcast %98 : vector<8x1xf32> to vector<8x32xf32>
    %100 = arith.subf %35, %99 : vector<8x32xf32>
    %101 = math.exp %100 : vector<8x32xf32>
    %cst_26 = arith.constant dense<0.000000e+00> : vector<8xf32>
    %102 = vector.multi_reduction <add>, %101, %cst_26 [1] : vector<8x32xf32> to vector<8xf32>
    %103 = vector.shape_cast %102 : vector<8xf32> to vector<8x1xf32>
    %104 = math.log %103 : vector<8x1xf32>
    %105 = arith.addf %104, %98 : vector<8x1xf32>
    %106 = vector.broadcast %105 : vector<8x1xf32> to vector<8x32xf32>
    %107 = arith.subf %35, %106 : vector<8x32xf32>
    %108 = arith.mulf %107, %96 : vector<8x32xf32>
    %cst_27 = arith.constant dense<0.000000e+00> : vector<8xf32>
    %109 = vector.multi_reduction <add>, %108, %cst_27 [1] : vector<8x32xf32> to vector<8xf32>
    %110 = vector.shape_cast %109 : vector<8xf32> to vector<8x1xf32>
    %111 = vector.broadcast %1 : f32 to vector<8x1xf32>
    %112 = arith.mulf %111, %110 : vector<8x1xf32>
    %cst_28 = arith.constant 1.000000e+00 : f32
    %113 = arith.subf %cst_28, %1 : f32
    %114 = arith.mulf %107, %53 : vector<8x32xf32>
    %cst_29 = arith.constant dense<0.000000e+00> : vector<8xf32>
    %115 = vector.multi_reduction <add>, %114, %cst_29 [1] : vector<8x32xf32> to vector<8xf32>
    %116 = vector.shape_cast %115 : vector<8xf32> to vector<8x1xf32>
    %117 = vector.broadcast %113 : f32 to vector<8x1xf32>
    %118 = arith.mulf %117, %116 : vector<8x1xf32>
    %119 = arith.addf %112, %118 : vector<8x1xf32>
    %cst_30 = arith.constant dense<0.000000e+00> : vector<1xf32>
    %120 = vector.multi_reduction <add>, %119, %cst_30 [0] : vector<8x1xf32> to vector<1xf32>
    %121 = vector.shape_cast %120 : vector<1xf32> to vector<1x1xf32>
    %122 = arith.addf %87, %121 : vector<1x1xf32>
    %cst_31 = arith.constant dense<0xFF800000> : vector<8xf32>
    %123 = vector.multi_reduction <maximumf>, %42, %cst_31 [1] : vector<8x32xf32> to vector<8xf32>
    %124 = vector.shape_cast %123 : vector<8xf32> to vector<8x1xf32>
    %125 = vector.broadcast %124 : vector<8x1xf32> to vector<8x32xf32>
    %126 = arith.subf %42, %125 : vector<8x32xf32>
    %127 = math.exp %126 : vector<8x32xf32>
    %cst_32 = arith.constant dense<0.000000e+00> : vector<8xf32>
    %128 = vector.multi_reduction <add>, %127, %cst_32 [1] : vector<8x32xf32> to vector<8xf32>
    %129 = vector.shape_cast %128 : vector<8xf32> to vector<8x1xf32>
    %130 = vector.broadcast %129 : vector<8x1xf32> to vector<8x32xf32>
    %131 = arith.divf %127, %130 : vector<8x32xf32>
    %cst_33 = arith.constant dense<0xFF800000> : vector<8xf32>
    %132 = vector.multi_reduction <maximumf>, %41, %cst_33 [1] : vector<8x32xf32> to vector<8xf32>
    %133 = vector.shape_cast %132 : vector<8xf32> to vector<8x1xf32>
    %134 = vector.broadcast %133 : vector<8x1xf32> to vector<8x32xf32>
    %135 = arith.subf %41, %134 : vector<8x32xf32>
    %136 = math.exp %135 : vector<8x32xf32>
    %cst_34 = arith.constant dense<0.000000e+00> : vector<8xf32>
    %137 = vector.multi_reduction <add>, %136, %cst_34 [1] : vector<8x32xf32> to vector<8xf32>
    %138 = vector.shape_cast %137 : vector<8xf32> to vector<8x1xf32>
    %139 = math.log %138 : vector<8x1xf32>
    %140 = arith.addf %139, %133 : vector<8x1xf32>
    %141 = vector.broadcast %140 : vector<8x1xf32> to vector<8x32xf32>
    %142 = arith.subf %41, %141 : vector<8x32xf32>
    %143 = arith.mulf %142, %131 : vector<8x32xf32>
    %cst_35 = arith.constant dense<0.000000e+00> : vector<8xf32>
    %144 = vector.multi_reduction <add>, %143, %cst_35 [1] : vector<8x32xf32> to vector<8xf32>
    %145 = vector.shape_cast %144 : vector<8xf32> to vector<8x1xf32>
    %146 = vector.broadcast %1 : f32 to vector<8x1xf32>
    %147 = arith.mulf %146, %145 : vector<8x1xf32>
    %cst_36 = arith.constant 1.000000e+00 : f32
    %148 = arith.subf %cst_36, %1 : f32
    %149 = arith.mulf %142, %53 : vector<8x32xf32>
    %cst_37 = arith.constant dense<0.000000e+00> : vector<8xf32>
    %150 = vector.multi_reduction <add>, %149, %cst_37 [1] : vector<8x32xf32> to vector<8xf32>
    %151 = vector.shape_cast %150 : vector<8xf32> to vector<8x1xf32>
    %152 = vector.broadcast %148 : f32 to vector<8x1xf32>
    %153 = arith.mulf %152, %151 : vector<8x1xf32>
    %154 = arith.addf %147, %153 : vector<8x1xf32>
    %cst_38 = arith.constant dense<0.000000e+00> : vector<1xf32>
    %155 = vector.multi_reduction <add>, %154, %cst_38 [0] : vector<8x1xf32> to vector<1xf32>
    %156 = vector.shape_cast %155 : vector<1xf32> to vector<1x1xf32>
    %157 = arith.addf %122, %156 : vector<1x1xf32>
    %cst_39 = arith.constant dense<0xFF800000> : vector<8xf32>
    %158 = vector.multi_reduction <maximumf>, %38, %cst_39 [1] : vector<8x32xf32> to vector<8xf32>
    %159 = vector.shape_cast %158 : vector<8xf32> to vector<8x1xf32>
    %160 = vector.broadcast %159 : vector<8x1xf32> to vector<8x32xf32>
    %161 = arith.subf %38, %160 : vector<8x32xf32>
    %162 = math.exp %161 : vector<8x32xf32>
    %cst_40 = arith.constant dense<0.000000e+00> : vector<8xf32>
    %163 = vector.multi_reduction <add>, %162, %cst_40 [1] : vector<8x32xf32> to vector<8xf32>
    %164 = vector.shape_cast %163 : vector<8xf32> to vector<8x1xf32>
    %165 = vector.broadcast %164 : vector<8x1xf32> to vector<8x32xf32>
    %166 = arith.divf %162, %165 : vector<8x32xf32>
    %cst_41 = arith.constant dense<0xFF800000> : vector<8xf32>
    %167 = vector.multi_reduction <maximumf>, %36, %cst_41 [1] : vector<8x32xf32> to vector<8xf32>
    %168 = vector.shape_cast %167 : vector<8xf32> to vector<8x1xf32>
    %169 = vector.broadcast %168 : vector<8x1xf32> to vector<8x32xf32>
    %170 = arith.subf %36, %169 : vector<8x32xf32>
    %171 = math.exp %170 : vector<8x32xf32>
    %cst_42 = arith.constant dense<0.000000e+00> : vector<8xf32>
    %172 = vector.multi_reduction <add>, %171, %cst_42 [1] : vector<8x32xf32> to vector<8xf32>
    %173 = vector.shape_cast %172 : vector<8xf32> to vector<8x1xf32>
    %174 = math.log %173 : vector<8x1xf32>
    %175 = arith.addf %174, %168 : vector<8x1xf32>
    %176 = vector.broadcast %175 : vector<8x1xf32> to vector<8x32xf32>
    %177 = arith.subf %36, %176 : vector<8x32xf32>
    %178 = arith.mulf %177, %166 : vector<8x32xf32>
    %cst_43 = arith.constant dense<0.000000e+00> : vector<8xf32>
    %179 = vector.multi_reduction <add>, %178, %cst_43 [1] : vector<8x32xf32> to vector<8xf32>
    %180 = vector.shape_cast %179 : vector<8xf32> to vector<8x1xf32>
    %181 = vector.broadcast %1 : f32 to vector<8x1xf32>
    %182 = arith.mulf %181, %180 : vector<8x1xf32>
    %cst_44 = arith.constant 1.000000e+00 : f32
    %183 = arith.subf %cst_44, %1 : f32
    %184 = arith.mulf %177, %53 : vector<8x32xf32>
    %cst_45 = arith.constant dense<0.000000e+00> : vector<8xf32>
    %185 = vector.multi_reduction <add>, %184, %cst_45 [1] : vector<8x32xf32> to vector<8xf32>
    %186 = vector.shape_cast %185 : vector<8xf32> to vector<8x1xf32>
    %187 = vector.broadcast %183 : f32 to vector<8x1xf32>
    %188 = arith.mulf %187, %186 : vector<8x1xf32>
    %189 = arith.addf %182, %188 : vector<8x1xf32>
    %cst_46 = arith.constant dense<0.000000e+00> : vector<1xf32>
    %190 = vector.multi_reduction <add>, %189, %cst_46 [0] : vector<8x1xf32> to vector<1xf32>
    %191 = vector.shape_cast %190 : vector<1xf32> to vector<1x1xf32>
    %192 = arith.addf %157, %191 : vector<1x1xf32>
    %cst_47 = arith.constant dense<0xFF800000> : vector<8xf32>
    %193 = vector.multi_reduction <maximumf>, %44, %cst_47 [1] : vector<8x32xf32> to vector<8xf32>
    %194 = vector.shape_cast %193 : vector<8xf32> to vector<8x1xf32>
    %195 = vector.broadcast %194 : vector<8x1xf32> to vector<8x32xf32>
    %196 = arith.subf %44, %195 : vector<8x32xf32>
    %197 = math.exp %196 : vector<8x32xf32>
    %cst_48 = arith.constant dense<0.000000e+00> : vector<8xf32>
    %198 = vector.multi_reduction <add>, %197, %cst_48 [1] : vector<8x32xf32> to vector<8xf32>
    %199 = vector.shape_cast %198 : vector<8xf32> to vector<8x1xf32>
    %200 = vector.broadcast %199 : vector<8x1xf32> to vector<8x32xf32>
    %201 = arith.divf %197, %200 : vector<8x32xf32>
    %cst_49 = arith.constant dense<0xFF800000> : vector<8xf32>
    %202 = vector.multi_reduction <maximumf>, %43, %cst_49 [1] : vector<8x32xf32> to vector<8xf32>
    %203 = vector.shape_cast %202 : vector<8xf32> to vector<8x1xf32>
    %204 = vector.broadcast %203 : vector<8x1xf32> to vector<8x32xf32>
    %205 = arith.subf %43, %204 : vector<8x32xf32>
    %206 = math.exp %205 : vector<8x32xf32>
    %cst_50 = arith.constant dense<0.000000e+00> : vector<8xf32>
    %207 = vector.multi_reduction <add>, %206, %cst_50 [1] : vector<8x32xf32> to vector<8xf32>
    %208 = vector.shape_cast %207 : vector<8xf32> to vector<8x1xf32>
    %209 = math.log %208 : vector<8x1xf32>
    %210 = arith.addf %209, %203 : vector<8x1xf32>
    %211 = vector.broadcast %210 : vector<8x1xf32> to vector<8x32xf32>
    %212 = arith.subf %43, %211 : vector<8x32xf32>
    %213 = arith.mulf %212, %201 : vector<8x32xf32>
    %cst_51 = arith.constant dense<0.000000e+00> : vector<8xf32>
    %214 = vector.multi_reduction <add>, %213, %cst_51 [1] : vector<8x32xf32> to vector<8xf32>
    %215 = vector.shape_cast %214 : vector<8xf32> to vector<8x1xf32>
    %216 = vector.broadcast %1 : f32 to vector<8x1xf32>
    %217 = arith.mulf %216, %215 : vector<8x1xf32>
    %cst_52 = arith.constant 1.000000e+00 : f32
    %218 = arith.subf %cst_52, %1 : f32
    %219 = arith.mulf %212, %53 : vector<8x32xf32>
    %cst_53 = arith.constant dense<0.000000e+00> : vector<8xf32>
    %220 = vector.multi_reduction <add>, %219, %cst_53 [1] : vector<8x32xf32> to vector<8xf32>
    %221 = vector.shape_cast %220 : vector<8xf32> to vector<8x1xf32>
    %222 = vector.broadcast %218 : f32 to vector<8x1xf32>
    %223 = arith.mulf %222, %221 : vector<8x1xf32>
    %224 = arith.addf %217, %223 : vector<8x1xf32>
    %cst_54 = arith.constant dense<0.000000e+00> : vector<1xf32>
    %225 = vector.multi_reduction <add>, %224, %cst_54 [0] : vector<8x1xf32> to vector<1xf32>
    %226 = vector.shape_cast %225 : vector<1xf32> to vector<1x1xf32>
    %227 = arith.addf %192, %226 : vector<1x1xf32>
    %cst_55 = arith.constant dense<0xFF800000> : vector<8xf32>
    %228 = vector.multi_reduction <maximumf>, %46, %cst_55 [1] : vector<8x32xf32> to vector<8xf32>
    %229 = vector.shape_cast %228 : vector<8xf32> to vector<8x1xf32>
    %230 = vector.broadcast %229 : vector<8x1xf32> to vector<8x32xf32>
    %231 = arith.subf %46, %230 : vector<8x32xf32>
    %232 = math.exp %231 : vector<8x32xf32>
    %cst_56 = arith.constant dense<0.000000e+00> : vector<8xf32>
    %233 = vector.multi_reduction <add>, %232, %cst_56 [1] : vector<8x32xf32> to vector<8xf32>
    %234 = vector.shape_cast %233 : vector<8xf32> to vector<8x1xf32>
    %235 = vector.broadcast %234 : vector<8x1xf32> to vector<8x32xf32>
    %236 = arith.divf %232, %235 : vector<8x32xf32>
    %cst_57 = arith.constant dense<0xFF800000> : vector<8xf32>
    %237 = vector.multi_reduction <maximumf>, %45, %cst_57 [1] : vector<8x32xf32> to vector<8xf32>
    %238 = vector.shape_cast %237 : vector<8xf32> to vector<8x1xf32>
    %239 = vector.broadcast %238 : vector<8x1xf32> to vector<8x32xf32>
    %240 = arith.subf %45, %239 : vector<8x32xf32>
    %241 = math.exp %240 : vector<8x32xf32>
    %cst_58 = arith.constant dense<0.000000e+00> : vector<8xf32>
    %242 = vector.multi_reduction <add>, %241, %cst_58 [1] : vector<8x32xf32> to vector<8xf32>
    %243 = vector.shape_cast %242 : vector<8xf32> to vector<8x1xf32>
    %244 = math.log %243 : vector<8x1xf32>
    %245 = arith.addf %244, %238 : vector<8x1xf32>
    %246 = vector.broadcast %245 : vector<8x1xf32> to vector<8x32xf32>
    %247 = arith.subf %45, %246 : vector<8x32xf32>
    %248 = arith.mulf %247, %236 : vector<8x32xf32>
    %cst_59 = arith.constant dense<0.000000e+00> : vector<8xf32>
    %249 = vector.multi_reduction <add>, %248, %cst_59 [1] : vector<8x32xf32> to vector<8xf32>
    %250 = vector.shape_cast %249 : vector<8xf32> to vector<8x1xf32>
    %251 = vector.broadcast %1 : f32 to vector<8x1xf32>
    %252 = arith.mulf %251, %250 : vector<8x1xf32>
    %cst_60 = arith.constant 1.000000e+00 : f32
    %253 = arith.subf %cst_60, %1 : f32
    %254 = arith.mulf %247, %53 : vector<8x32xf32>
    %cst_61 = arith.constant dense<0.000000e+00> : vector<8xf32>
    %255 = vector.multi_reduction <add>, %254, %cst_61 [1] : vector<8x32xf32> to vector<8xf32>
    %256 = vector.shape_cast %255 : vector<8xf32> to vector<8x1xf32>
    %257 = vector.broadcast %253 : f32 to vector<8x1xf32>
    %258 = arith.mulf %257, %256 : vector<8x1xf32>
    %259 = arith.addf %252, %258 : vector<8x1xf32>
    %cst_62 = arith.constant dense<0.000000e+00> : vector<1xf32>
    %260 = vector.multi_reduction <add>, %259, %cst_62 [0] : vector<8x1xf32> to vector<1xf32>
    %261 = vector.shape_cast %260 : vector<1xf32> to vector<1x1xf32>
    %262 = arith.addf %227, %261 : vector<1x1xf32>
    %cst_63 = arith.constant 0.000000e+00 : f32
    %263 = vector.broadcast %cst_63 : f32 to vector<1x1xf32>
    %264 = arith.subf %263, %262 : vector<1x1xf32>
    %cst_64 = arith.constant 0.020833334 : f32
    %265 = vector.broadcast %cst_64 : f32 to vector<1x1xf32>
    %266 = arith.mulf %264, %265 : vector<1x1xf32>
    %c0_65 = arith.constant 0 : index
    %c0_66 = arith.constant 0 : index
    %267 = vector.load %arg4[%c0_65, %c0_66] : memref<1x1xf32, #tpu.memory_space<vmem>>, vector<1x1xf32>
    tpu.vector_store %arg4[%c0_65, %c0_66], %266 {strides = array<i32>} : memref<1x1xf32, #tpu.memory_space<vmem>>, vector<1x1xf32>,
    return
  }
}

module attributes {stable_mosaic.version = 11 : i64} {
  func.func @_heads_kernel(%arg0: memref<24x32xf32, #tpu.memory_space<vmem>>, %arg1: memref<1x32xf32, #tpu.memory_space<vmem>>, %arg2: memref<64x32xf32, #tpu.memory_space<vmem>>, %arg3: memref<32x64xf32, #tpu.memory_space<vmem>>, %arg4: memref<1x64xf32, #tpu.memory_space<vmem>>, %arg5: memref<64x1xi32, #tpu.memory_space<vmem>>, %arg6: memref<1xf32, #tpu.memory_space<smem>>, %arg7: memref<1x2xf32, #tpu.memory_space<vmem>>) attributes {dimension_semantics = [], scalar_prefetch = 0 : i64, scratch_operands = 0 : i64, tpu.core_type = #tpu.core_type<tc>} {
    %c0 = arith.constant 0 : index
    %c0_0 = arith.constant 0 : index
    %0 = vector.load %arg0[%c0, %c0_0] : memref<24x32xf32, #tpu.memory_space<vmem>>, vector<24x32xf32>
    %c0_1 = arith.constant 0 : index
    %c0_2 = arith.constant 0 : index
    %1 = vector.load %arg1[%c0_1, %c0_2] : memref<1x32xf32, #tpu.memory_space<vmem>>, vector<1x32xf32>
    %2 = vector.broadcast %1 : vector<1x32xf32> to vector<24x32xf32>
    %3 = arith.mulf %0, %2 : vector<24x32xf32>
    %cst = arith.constant dense<0.000000e+00> : vector<24xf32>
    %4 = vector.multi_reduction <add>, %3, %cst [1] : vector<24x32xf32> to vector<24xf32>
    %5 = vector.shape_cast %4 : vector<24xf32> to vector<24x1xf32>
    %c0_3 = arith.constant 0 : index
    %6 = memref.load %arg6[%c0_3] : memref<1xf32, #tpu.memory_space<smem>>
    %7 = vector.broadcast %6 : f32 to vector<24x1xf32>
    %8 = arith.addf %5, %7 : vector<24x1xf32>
    %9 = tpu.iota {dimensions = array<i32: 0>} : vector<24x1xi32>
    %c8_i32 = arith.constant 8 : i32
    %10 = vector.broadcast %c8_i32 : i32 to vector<24x1xi32>
    %11 = arith.cmpi slt, %9, %10 : vector<24x1xi32>
    %cst_4 = arith.constant -1.000000e+00 : f32
    %cst_5 = arith.constant 1.000000e+00 : f32
    %12 = vector.broadcast %cst_4 : f32 to vector<24x1xf32>
    %13 = vector.broadcast %cst_5 : f32 to vector<24x1xf32>
    %14 = arith.select %11, %12, %13 : vector<24x1xi1>, vector<24x1xf32>
    %15 = arith.mulf %14, %8 : vector<24x1xf32>
    %cst_6 = arith.constant 0.000000e+00 : f32
    %16 = vector.broadcast %cst_6 : f32 to vector<24x1xf32>
    %17 = arith.maximumf %15, %16 : vector<24x1xf32>
    %18 = math.absf %15 : vector<24x1xf32>
    %cst_7 = arith.constant 0.000000e+00 : f32
    %19 = vector.broadcast %cst_7 : f32 to vector<24x1xf32>
    %20 = arith.subf %19, %18 : vector<24x1xf32>
    %21 = math.exp %20 : vector<24x1xf32>
    %cst_8 = arith.constant 1.000000e+00 : f32
    %22 = vector.broadcast %cst_8 : f32 to vector<24x1xf32>
    %23 = arith.addf %22, %21 : vector<24x1xf32>
    %24 = math.log %23 : vector<24x1xf32>
    %25 = arith.addf %17, %24 : vector<24x1xf32>
    %cst_9 = arith.constant dense<0.000000e+00> : vector<1xf32>
    %26 = vector.multi_reduction <add>, %25, %cst_9 [0] : vector<24x1xf32> to vector<1xf32>
    %27 = vector.shape_cast %26 : vector<1xf32> to vector<1x1xf32>
    %cst_10 = arith.constant 0.0416666679 : f32
    %28 = vector.broadcast %cst_10 : f32 to vector<1x1xf32>
    %29 = arith.mulf %27, %28 : vector<1x1xf32>
    %c0_11 = arith.constant 0 : index
    %c0_12 = arith.constant 0 : index
    %30 = vector.load %arg2[%c0_11, %c0_12] : memref<64x32xf32, #tpu.memory_space<vmem>>, vector<64x32xf32>
    %c0_13 = arith.constant 0 : index
    %c0_14 = arith.constant 0 : index
    %31 = vector.load %arg3[%c0_13, %c0_14] : memref<32x64xf32, #tpu.memory_space<vmem>>, vector<32x64xf32>
    %cst_15 = arith.constant dense<0.000000e+00> : vector<64x64xf32>
    %32 = tpu.matmul %30, %31, %cst_15 {dimension_numbers = #tpu.dot_dimension_numbers<[1], [0], [0], [1], [0, 0, 1, 1], [], []>} : vector<64x32xf32>, vector<32x64xf32>, vector<64x64xf32> -> vector<64x64xf32>
    %c0_16 = arith.constant 0 : index
    %c0_17 = arith.constant 0 : index
    %33 = vector.load %arg4[%c0_16, %c0_17] : memref<1x64xf32, #tpu.memory_space<vmem>>, vector<1x64xf32>
    %34 = vector.broadcast %33 : vector<1x64xf32> to vector<64x64xf32>
    %35 = arith.addf %32, %34 : vector<64x64xf32>
    %cst_18 = arith.constant dense<0xFF800000> : vector<64xf32>
    %36 = vector.multi_reduction <maximumf>, %35, %cst_18 [1] : vector<64x64xf32> to vector<64xf32>
    %37 = vector.shape_cast %36 : vector<64xf32> to vector<64x1xf32>
    %38 = vector.broadcast %37 : vector<64x1xf32> to vector<64x64xf32>
    %39 = arith.subf %35, %38 : vector<64x64xf32>
    %40 = math.exp %39 : vector<64x64xf32>
    %cst_19 = arith.constant dense<0.000000e+00> : vector<64xf32>
    %41 = vector.multi_reduction <add>, %40, %cst_19 [1] : vector<64x64xf32> to vector<64xf32>
    %42 = vector.shape_cast %41 : vector<64xf32> to vector<64x1xf32>
    %43 = math.log %42 : vector<64x1xf32>
    %44 = arith.addf %43, %37 : vector<64x1xf32>
    %45 = vector.broadcast %44 : vector<64x1xf32> to vector<64x64xf32>
    %46 = arith.subf %35, %45 : vector<64x64xf32>
    %c0_20 = arith.constant 0 : index
    %c0_21 = arith.constant 0 : index
    %47 = vector.load %arg5[%c0_20, %c0_21] : memref<64x1xi32, #tpu.memory_space<vmem>>, vector<64x1xi32>
    %48 = tpu.iota {dimensions = array<i32: 1>} : vector<64x64xi32>
    %49 = vector.broadcast %47 : vector<64x1xi32> to vector<64x64xi32>
    %50 = arith.cmpi eq, %48, %49 : vector<64x64xi32>
    %51 = arith.extui %50 : vector<64x64xi1> to vector<64x64xi32>
    %52 = arith.sitofp %51 : vector<64x64xi32> to vector<64x64xf32>
    %53 = arith.mulf %46, %52 : vector<64x64xf32>
    %cst_22 = arith.constant dense<0.000000e+00> : vector<64xf32>
    %54 = vector.multi_reduction <add>, %53, %cst_22 [1] : vector<64x64xf32> to vector<64xf32>
    %55 = vector.shape_cast %54 : vector<64xf32> to vector<64x1xf32>
    %cst_23 = arith.constant 0.000000e+00 : f32
    %56 = vector.broadcast %cst_23 : f32 to vector<64x1xf32>
    %57 = arith.subf %56, %55 : vector<64x1xf32>
    %c0_i32 = arith.constant 0 : i32
    %58 = vector.broadcast %c0_i32 : i32 to vector<64x1xi32>
    %59 = arith.cmpi ne, %47, %58 : vector<64x1xi32>
    %60 = arith.extui %59 : vector<64x1xi1> to vector<64x1xi32>
    %61 = arith.sitofp %60 : vector<64x1xi32> to vector<64x1xf32>
    %62 = arith.mulf %57, %61 : vector<64x1xf32>
    %cst_24 = arith.constant dense<0.000000e+00> : vector<1xf32>
    %63 = vector.multi_reduction <add>, %62, %cst_24 [0] : vector<64x1xf32> to vector<1xf32>
    %64 = vector.shape_cast %63 : vector<1xf32> to vector<1x1xf32>
    %cst_25 = arith.constant dense<0.000000e+00> : vector<1xf32>
    %65 = vector.multi_reduction <add>, %61, %cst_25 [0] : vector<64x1xf32> to vector<1xf32>
    %66 = vector.shape_cast %65 : vector<1xf32> to vector<1x1xf32>
    %cst_26 = arith.constant 1.000000e+00 : f32
    %67 = vector.broadcast %cst_26 : f32 to vector<1x1xf32>
    %68 = arith.maximumf %66, %67 : vector<1x1xf32>
    %69 = arith.divf %64, %68 : vector<1x1xf32>
    %70 = tpu.concatenate %29, %69 in 1 : vector<1x1xf32>, vector<1x1xf32> -> vector<1x2xf32>
    %c0_27 = arith.constant 0 : index
    %c0_28 = arith.constant 0 : index
    %71 = vector.load %arg7[%c0_27, %c0_28] : memref<1x2xf32, #tpu.memory_space<vmem>>, vector<1x2xf32>
    tpu.vector_store %arg7[%c0_27, %c0_28], %70 {strides = array<i32>} : memref<1x2xf32, #tpu.memory_space<vmem>>, vector<1x2xf32>,
    return
  }
}

</mosaic_0001>

<bundles_post_ra>
// kernel: tmmf_forward.4
= control target key start
LH: loop header
LB: loop body
LE: loop exit
PB: predicated region body
PF: predicated region fallthrough
CT: control target
= control target key end

     0   :  { %12 = vsyncpa [#allocation4], 0  ;;  %s1383_s0 = inlined_call_operand.vmem [shape: f32[48,198], index: 0, kind: input, shape index: {}]   ;;  %s1384_s1 = inlined_call_operand.vmem [shape: f32[198,128], index: 1, kind: input, shape index: {}]   ;;  %s1385_s2 = inlined_call_operand.vmem [shape: f32[72,128], index: 2, kind: input, shape index: {}]   ;;  %s1386_s3 = inlined_call_operand.vmem [shape: f32[2], index: 3, kind: input, shape index: {}]   ;;  %s1387_s4 = inlined_call_operand.hbm [shape: f32[1,1], index: 4, kind: output, shape index: {0}]   ;;  %s1388_s5 = inlined_call_operand.vmem [shape: f32[8,64], index: 5, kind: output, shape index: {1}]   ;;  %s1389_s6 = inlined_call_operand.vmem [shape: f32[48,128], index: 6, kind: output, shape index: {2}]  }
   0x1   :  { %13 = vsyncpa [#allocation3], 0  ;;  %s26_s23 = sshll.u32 %s1386_s3, 4  ;;  %s27_s23 = int_to_ptr.vmem [resolvable:$true] %s26_s23 }
   0x2   :  { %s976_s24 = scalar_lea.vmem %s27_s23, 16  ;;  %p981_p1 = scmp.lt.s32.totalorder %s27_s23, %s27_s23 }
   0x3   :  { %p977_p0 = scmp.ne.s32.totalorder %s27_s23, %s976_s24  ;;  %p982_p2 = scmp.lt.s32.totalorder %s976_s24, %s976_s24 }
   0x5   :  { %p983_p3 = por %p982_p2, %p981_p1 }
   0x7   :  { %p984_p4 = pnand %p983_p3, %p977_p0 }
   0x9   :  { %987 = shalt.err (!%p984_p4)
}
   0xa   :  { %s1014_s25 = smov [#allocation2]  }
   0xb   :  { %29 = dma.vmem_to_smem %s27_s23, 16, %s1014_s25, [#allocation4]  }
   0xc   :  { %1010 = dma.done.wait [#allocation4], 16  }
   0xd   :  { %1011 = vsyncadd [#allocation4], 4294967280 }
   0xe   :  { %33 = sfence }
   0xf   :  { %v48_v0 = vld [vmem:[%s1384_s1] sm:$0xff]  ;;  %v49_v1 = vld [vmem:[%s1384_s1 + $0x8] sm:$0xff]  ;;  %v50_v2 = vld [vmem:[%s1384_s1 + $0x10] sm:$0xff]  ;;  %v1015_v3 = vmov 0.0|0.0   ;;  %vm73_vm0 = vcmask 572416   ;;  %v1016_v38 = vmov 0.0  }
  0x10   :  { %851 = vmatprep.subr.bf16.mxu0 %v1015_v3  ;;  %v852_v4 = vpack.c.bf16 %v49_v1, %v48_v0  ;;  %v51_v5 = vld [vmem:[%s1384_s1 + $0x18] sm:$0xff]  ;;  %v52_v7 = vld [vmem:[%s1384_s1 + $0x20] sm:$0xff]  ;;  %v53_v8 = vld [vmem:[%s1384_s1 + $0x28] sm:$0xff]  ;;  %vm92_vm1 = vcmask 1045504   ;;  %s34_s25 = sld [smem:[#allocation2]]  ;;  %vm494_vm2 = vcmask 261120  }
  0x11   :  { %v855_v6 = vpack.c.bf16 %v51_v5, %v50_v2  ;;  %v858_v9 = vpack.c.bf16 %v53_v8, %v52_v7  ;;  %v54_v10 = vld [vmem:[%s1384_s1 + $0x30] sm:$0xff]  ;;  %v55_v11 = vld [vmem:[%s1384_s1 + $0x38] sm:$0xff]  ;;  %v37_v12 = vld [vmem:[%s1383_s0 + $0x8] sm:$0xff]  ;;  %s786_s26 = sld [smem:[#allocation2 + $0x1]]  ;;  %vm496_vm4 = vcmask 523264   ;;  %s1018_s3 = smov [#allocation5]  }
  0x12   :  { %853 = vmatpush1.bf16.msra.mxu0 %v852_v4  ;;  %788 = vmatprep.mubr.msk.f32.mxu0 %vm73_vm0, %v37_v12  ;;  %v861_v13 = vpack.c.bf16 %v55_v11, %v54_v10  ;;  %v56_v14 = vld [vmem:[%s1384_s1 + $0x40] sm:$0xff]  ;;  %v57_v15 = vld [vmem:[%s1384_s1 + $0x48] sm:$0xff]  ;;  %v58_v17 = vld [vmem:[%s1384_s1 + $0x50] sm:$0xff]  ;;  %s769_s30 = sshll.u32 %s1018_s3, 4  ;;  %vm761_vm5 = vcmask 0   ;;  %s770_s30 = int_to_ptr.vmem [resolvable:$true] %s769_s30 }
  0x13   :  { %854 = vmatprep.subr.bf16.mxu0 %v1015_v3  ;;  %v864_v16 = vpack.c.bf16 %v57_v15, %v56_v14  ;;  %v59_v18 = vld [vmem:[%s1384_s1 + $0x58] sm:$0xff]  ;;  %v60_v20 = vld [vmem:[%s1384_s1 + $0x60] sm:$0xff]  ;;  %v61_v21 = vld [vmem:[%s1384_s1 + $0x68] sm:$0xff]  ;;  %s988_s7 = scalar_lea.vmem %s770_s30, 16  ;;  %p993_p6 = scmp.lt.s32.totalorder %s770_s30, %s770_s30 }
  0x14   :  { %v867_v19 = vpack.c.bf16 %v59_v18, %v58_v17  ;;  %v870_v22 = vpack.c.bf16 %v61_v21, %v60_v20  ;;  %v62_v23 = vld [vmem:[%s1384_s1 + $0x70] sm:$0xff]  ;;  %v63_v24 = vld [vmem:[%s1384_s1 + $0x78] sm:$0xff]  ;;  %v64_v26 = vld [vmem:[%s1384_s1 + $0x80] sm:$0xff]  ;;  %p989_p5 = scmp.ne.s32.totalorder %s770_s30, %s988_s7 }
  0x15   :  { %v873_v25 = vpack.c.bf16 %v63_v24, %v62_v23  ;;  %v65_v27 = vld [vmem:[%s1384_s1 + $0x88] sm:$0xff]  ;;  %v66_v29 = vld [vmem:[%s1384_s1 + $0x90] sm:$0xff]  ;;  %v67_v30 = vld [vmem:[%s1384_s1 + $0x98] sm:$0xff] }
  0x16   :  { %856 = vmatpush1.bf16.msra.mxu0 %v855_v6  ;;  %v876_v28 = vpack.c.bf16 %v65_v27, %v64_v26  ;;  %v879_v31 = vpack.c.bf16 %v67_v30, %v66_v29  ;;  %v68_v32 = vld [vmem:[%s1384_s1 + $0xa0] sm:$0xff]  ;;  %v69_v33 = vld [vmem:[%s1384_s1 + $0xa8] sm:$0xff]  ;;  %v70_v35 = vld [vmem:[%s1384_s1 + $0xb0] sm:$0xff] }
  0x17   :  { %857 = vmatprep.subr.bf16.mxu0 %v1015_v3  ;;  %v882_v34 = vpack.c.bf16 %v69_v33, %v68_v32  ;;  %v71_v36 = vld [vmem:[%s1384_s1 + $0xb8] sm:$0xff]  ;;  %v72_v39 = vld [vmem:[%s1384_s1 + $0xc0] sm:$0x3f]  ;;  %v38_v42 = vld [vmem:[%s1383_s0 + $0x10] sm:$0xff]  ;;  %s535_s27 = ssub.f32 1.0, %s786_s26 }
  0x18   :  { %v885_v37 = vpack.c.bf16 %v71_v36, %v70_v35  ;;  %v36_v40 = vld [vmem:[%s1383_s0] sm:$0xff]  ;;  %v39_v41 = vld [vmem:[%s1383_s0 + $0x18] sm:$0xff]  ;;  %v41_v43 = vld [vmem:[%s1383_s0 + $0x28] sm:$0xff] }
  0x19   :  { %v40_v44 = vld [vmem:[%s1383_s0 + $0x20] sm:$0xff]  ;;  %v43_v45 = vld [vmem:[%s1383_s0 + $0x38] sm:$0xff]  ;;  %v42_v46 = vld [vmem:[%s1383_s0 + $0x30] sm:$0xff] }
  0x1a   :  { %859 = vmatpush1.bf16.msra.mxu0 %v858_v9  ;;  %v45_v47 = vld [vmem:[%s1383_s0 + $0x48] sm:$0xff]  ;;  %v44_v48 = vld [vmem:[%s1383_s0 + $0x40] sm:$0xff]  ;;  %v47_v49 = vld [vmem:[%s1383_s0 + $0x58] sm:$0xff] }
  0x1b   :  { %860 = vmatprep.subr.bf16.mxu0 %v1015_v3  ;;  %v46_v50 = vld [vmem:[%s1383_s0 + $0x50] sm:$0xff]  ;;  %v234_v17 = vld [vmem:[%s1385_s2 + $0x8] sm:$0xff]  ;;  %v236_v30 = vld [vmem:[%s1385_s2 + $0x18] sm:$0xff] }
  0x1c   :  { %v235_v18 = vld [vmem:[%s1385_s2 + $0x10] sm:$0xff]  ;;  %v237_v35 = vld [vmem:[%s1385_s2 + $0x20] sm:$0xff]  ;;  %v238_v36 = vld [vmem:[%s1385_s2 + $0x28] sm:$0xff] }
  0x1e   :  { %862 = vmatpush1.bf16.msra.mxu0 %v861_v13  ;;  %v233_v13 = vld [vmem:[%s1385_s2] sm:$0xff] }
  0x1f   :  { %863 = vmatprep.subr.bf16.mxu0 %v1015_v3 }
  0x22   :  { %865 = vmatpush1.bf16.msra.mxu0 %v864_v16 }
  0x23   :  { %866 = vmatprep.subr.bf16.mxu0 %v1015_v3 }
  0x26   :  { %868 = vmatpush1.bf16.msra.mxu0 %v867_v19 }
  0x27   :  { %869 = vmatprep.subr.bf16.mxu0 %v1015_v3 }
  0x2a   :  { %871 = vmatpush1.bf16.msra.mxu0 %v870_v22  ;;  %v891_v22 = vpack.c.bf16 %v235_v18, %v234_v17 }
  0x2b   :  { %872 = vmatprep.subr.bf16.mxu0 %v1015_v3 }
  0x2e   :  { %874 = vmatpush1.bf16.msra.mxu0 %v873_v25 }
  0x2f   :  { %875 = vmatprep.subr.bf16.mxu0 %v1015_v3 }
  0x32   :  { %877 = vmatpush1.bf16.msra.mxu0 %v876_v28 }
  0x33   :  { %878 = vmatprep.subr.bf16.mxu0 %v1015_v3 }
  0x36   :  { %880 = vmatpush1.bf16.msra.mxu0 %v879_v31 }
  0x37   :  { %881 = vmatprep.subr.bf16.mxu0 %v1015_v3 }
  0x3a   :  { %883 = vmatpush1.bf16.msra.mxu0 %v882_v34 }
  0x3b   :  { %884 = vmatprep.subr.bf16.mxu0 %v1015_v3 }
  0x3e   :  { %886 = vmatpush1.bf16.msra.mxu0 %v885_v37 }
  0x3f   :  { %144 = vmatprep.subr.mxu0 %v1016_v38 }
  0x42   :  { %787 = vmatpush1.msk.msra.mxu0 %vm92_vm1, %v72_v39  ;;  %v899_v39 = vpack.c.bf16 %v238_v36, %v237_v35 }
  0x43   :  { %161 = vmatmul.mubr.f32.vlgmr.msra.gmra.mrb[0].mxu0 %v36_v40  ;;  %v239_v40 = vld [vmem:[%s1385_s2 + $0x30] sm:$0xff] }
  0x44   :  { %789 = vmatprep.mubr.msk.f32.mxu0 %vm73_vm0, %v39_v41 }
  0x47   :  { %166 = vmatmul.mubr.f32.gmra.mrb[2].mxu0 %v38_v42  ;;  %v240_v42 = vld [vmem:[%s1385_s2 + $0x38] sm:$0xff] }
  0x48   :  { %790 = vmatprep.mubr.msk.f32.mxu0 %vm73_vm0, %v41_v43  ;;  %v241_v43 = vld [vmem:[%s1385_s2 + $0x40] sm:$0xff]  ;;  %s1017_s2 = smov 32  }
  0x4b   :  { %171 = vmatmul.mubr.f32.gmra.mrb[4].mxu0 %v40_v44  ;;  %v907_v44 = vpack.c.bf16 %v241_v43, %v240_v42 }
  0x4c   :  { %791 = vmatprep.mubr.msk.f32.mxu0 %vm73_vm0, %v43_v45  ;;  %v327_v45 = vstv %s34_s25 }
  0x4f   :  { %176 = vmatmul.mubr.f32.gmra.mrb[6].mxu0 %v42_v46 }
  0x50   :  { %792 = vmatprep.mubr.msk.f32.mxu0 %vm73_vm0, %v45_v47 }
  0x53   :  { %181 = vmatmul.mubr.f32.gmra.mrb[8].mxu0 %v44_v48 }
  0x54   :  { %793 = vmatprep.mubr.msk.f32.mxu0 %vm73_vm0, %v47_v49 }
  0x57   :  { %186 = vmatmul.mubr.f32.gmra.mrb[10].mxu0 %v46_v50 }
 0x116   :  { %v1175_v51 = vpop.f32.mrb[0].mxu0 }
 0x117   :  { %v164_v52 = vpop.f32.mrb[1].mxu0  ;;  %v191_v63 = vmul.f32 %v1175_v51, %v1175_v51 }
 0x11a   :  { %v167_v53 = vpop.f32.mrb[2].mxu0 }
 0x11b   :  { %v169_v54 = vpop.f32.mrb[3].mxu0  ;;  %v192_v55 = vmul.f32 %v167_v53, %v167_v53 }
 0x11d   :  { %199 = vadd.xlane.f32.xlu0 %v192_v55 }
 0x11e   :  { %v172_v56 = vpop.f32.mrb[4].mxu0 }
 0x11f   :  { %v193_v57 = vmul.f32 %v172_v56, %v172_v56  ;;  %v174_v58 = vpop.f32.mrb[5].mxu0 }
 0x121   :  { %201 = vadd.xlane.f32.xlu1 %v193_v57 }
 0x122   :  { %v177_v59 = vpop.f32.mrb[6].mxu0 }
 0x123   :  { %v194_v60 = vmul.f32 %v177_v59, %v177_v59  ;;  %v179_v61 = vpop.f32.mrb[7].mxu0 }
 0x125   :  { %203 = vadd.xlane.f32.xlu1 %v194_v60 }
 0x126   :  { %v182_v62 = vpop.f32.mrb[8].mxu0 }
 0x127   :  { %v195_v0 = vmul.f32 %v182_v62, %v182_v62  ;;  %v184_v1 = vpop.f32.mrb[9].mxu0 }
 0x129   :  { %197 = vadd.xlane.f32.xlu1 %v191_v63  ;;  %205 = vadd.xlane.f32.xlu0 %v195_v0 }
 0x12a   :  { %v187_v2 = vpop.f32.mrb[10].mxu0 }
 0x12b   :  { %v196_v3 = vmul.f32 %v187_v2, %v187_v2  ;;  %v189_v4 = vpop.f32.mrb[11].mxu0 }
 0x12d   :  { %207 = vadd.xlane.f32.xlu0 %v196_v3 }
 0x1aa   :  { %v200_v5 = vpop.xlane.xlu0 %199 }
 0x1ab   :  { %v210_v6 = vmax.f32 %v200_v5, 1e-24 }
 0x1ad   :  { %916 = vrsqrt.f32 %v210_v6 }
 0x1ae   :  { %v202_v7 = vpop.xlane.xlu1 %201 }
 0x1af   :  { %v211_v8 = vmax.f32 %v202_v7, 1e-24 }
 0x1b1   :  { %918 = vrsqrt.f32 %v211_v8 }
 0x1b2   :  { %v204_v9 = vpop.xlane.xlu1 %203 }
 0x1b3   :  { %v212_v10 = vmax.f32 %v204_v9, 1e-24 }
 0x1b5   :  { %920 = vrsqrt.f32 %v212_v10 }
 0x1b6   :  { %v198_v11 = vpop.xlane.xlu1 %197  ;;  %v206_v12 = vpop.xlane.xlu0 %205 }
 0x1b7   :  { %v917_v14 = vpop.eup %916  ;;  %v209_v15 = vmax.f32 %v198_v11, 1e-24  ;;  %v213_v16 = vmax.f32 %v206_v12, 1e-24 }
 0x1b8   :  { %v222_v19 = vmul.f32 %v917_v14, %v167_v53 }
 0x1b9   :  { %922 = vrsqrt.f32 %v209_v15 }
 0x1ba   :  { %924 = vrsqrt.f32 %v213_v16  ;;  %v208_v20 = vpop.xlane.xlu0 %207  ;;  %228 = vst [vmem:[%s1389_s6 + $0x8] sm:$0xff] %v222_v19  ;;  %v887_v21 = vpack.c.bf16 %v233_v13, %v222_v19 }
 0x1bb   :  { %v919_v23 = vpop.eup %918  ;;  %v214_v24 = vmax.f32 %v208_v20, 1e-24 }
 0x1bc   :  { %888 = vmatprep.subr.bf16.mxu1 %v887_v21  ;;  %v223_v25 = vmul.f32 %v919_v23, %v172_v56 }
 0x1bd   :  { %926 = vrsqrt.f32 %v214_v24  ;;  %890 = vmatpush3.bf16.xpose.msra.mxu1 %v887_v21 }
 0x1be   :  { %229 = vst [vmem:[%s1389_s6 + $0x10] sm:$0xff] %v223_v25  ;;  %823 = vmatprep.mubr.f32.mxu1 %v223_v25  ;;  %892 = vmatprep.subr.bf16.mxu1 %v891_v22 }
 0x1bf   :  { %v921_v26 = vpop.eup %920 }
 0x1c0   :  { %v224_v27 = vmul.f32 %v921_v26, %v177_v59 }
 0x1c2   :  { %230 = vst [vmem:[%s1389_s6 + $0x18] sm:$0xff] %v224_v27 }
 0x1c3   :  { %v923_v28 = vpop.eup %922 }
 0x1c4   :  { %v925_v29 = vpop.eup %924  ;;  %v221_v31 = vmul.f32 %v923_v28, %v1175_v51 }
 0x1c5   :  { %894 = vmatpush3.bf16.xpose.msra.mxu1 %v891_v22  ;;  %v225_v32 = vmul.f32 %v925_v29, %v182_v62 }
 0x1c6   :  { %227 = vst [vmem:[%s1389_s6] sm:$0xff] %v221_v31 }
 0x1c7   :  { %v927_v33 = vpop.eup %926  ;;  %231 = vst [vmem:[%s1389_s6 + $0x20] sm:$0xff] %v225_v32  ;;  %v895_v34 = vpack.c.bf16 %v236_v30, %v225_v32 }
 0x1c8   :  { %v226_v37 = vmul.f32 %v927_v33, %v187_v2 }
 0x1c9   :  { %896 = vmatprep.subr.bf16.mxu1 %v895_v34 }
 0x1ca   :  { %232 = vst [vmem:[%s1389_s6 + $0x28] sm:$0xff] %v226_v37  ;;  %v903_v41 = vpack.c.bf16 %v239_v40, %v226_v37 }
 0x1cc   :  { %824 = vmatmul.mubr.f32.vlgmr.msra.gmra.mrb[0].mxu1 %v224_v27 }
 0x1cd   :  { %826 = vmatprep.mubr.f32.mxu1 %v225_v32  ;;  %898 = vmatpush3.bf16.xpose.msra.mxu1 %v895_v34 }
 0x1ce   :  { %900 = vmatprep.subr.bf16.mxu1 %v899_v39 }
 0x1d0   :  { %827 = vmatmul.mubr.f32.gmra.mrb[2].mxu1 %v226_v37 }
 0x1d1   :  { %837 = vmatprep.mubr.f32.mxu1 %v221_v31 }
 0x1d5   :  { %902 = vmatpush3.bf16.xpose.msra.mxu1 %v899_v39 }
 0x1d6   :  { %904 = vmatprep.subr.bf16.mxu1 %v903_v41 }
 0x1dc   :  { %838 = vmatmul.mubr.f32.vlgmr.msra.gmra.mrb[4].mxu1 %v222_v19 }
 0x1dd   :  { %906 = vmatpush3.bf16.xpose.msra.mxu1 %v903_v41  ;;  %848 = vmatprep.mubr.f32.mxu1 %v221_v31 }
 0x1de   :  { %908 = vmatprep.subr.bf16.mxu1 %v907_v44 }
 0x1e5   :  { %910 = vmatpush3.bf16.xpose.msra.mxu1 %v907_v44 }
 0x1ec   :  { %849 = vmatmul.mubr.f32.vlgmr.msra.gmra.mrb[6].mxu1 %v222_v19 }
 0x29f   :  { %v825_v46 = vpop.f32.mrb[0].mxu1 }
 0x2a0   :  { %v1225_v47 = vmul.f32 %v825_v46, %v327_v45  ;;  %v308_v48 = vpop.f32.mrb[1].mxu1 }
 0x2a1   :  { %v1227_v49 = vmul.f32 %v327_v45, %v308_v48 }
 0x2a2   :  { %v644_v50 = vsel %vm494_vm2, %v1225_v47, -inf }
 0x2a3   :  { %v828_v51 = vpop.f32.mrb[2].mxu1  ;;  %645 = vmax.xlane.f32.xlu1 %v644_v50  ;;  %v560_v54 = vsel %vm494_vm2, %v1227_v49, -inf  ;;  %v1252_v6 = vadd.f32 %v1225_v47, %v1227_v49 }
 0x2a4   :  { %v318_v52 = vpop.f32.mrb[3].mxu1  ;;  %v1246_v4 = vmul.f32 %v828_v51, %v327_v45 }
 0x2a5   :  { %v330_v53 = vmul.f32 %v327_v45, %v318_v52  ;;  %v728_v8 = vsel %vm494_vm2, %v1252_v6, -inf }
 0x2a6   :  { %v633_v10 = vsel %vm494_vm2, %v1246_v4, -inf }
 0x2a7   :  { %561 = vmax.xlane.f32.xlu1 %v560_v54  ;;  %v549_v55 = vsel %vm494_vm2, %v330_v53, -inf  ;;  %v1259_v9 = vadd.f32 %v1246_v4, %v330_v53 }
 0x2a8   :  { %550 = vmax.xlane.f32.xlu0 %v549_v55 }
 0x2a9   :  { %v717_v12 = vsel %vm494_vm2, %v1259_v9, -inf }
 0x2af   :  { %v839_v56 = vpop.f32.mrb[4].mxu1 }
 0x2b0   :  { %v408_v57 = vmul.f32 %v839_v56, %v327_v45  ;;  %v398_v58 = vpop.f32.mrb[5].mxu1 }
 0x2b1   :  { %v1234_v59 = vmul.f32 %v398_v58, %v327_v45 }
 0x2b2   :  { %v505_v60 = vsel %vm494_vm2, %v408_v57, -inf }
 0x2b3   :  { %506 = vmax.xlane.f32.xlu1 %v505_v60  ;;  %v516_v61 = vsel %vm494_vm2, %v1234_v59, -inf }
 0x2b4   :  { %517 = vmax.xlane.f32.xlu0 %v516_v61 }
 0x2bf   :  { %v850_v62 = vpop.f32.mrb[6].mxu1 }
 0x2c0   :  { %v485_v63 = vmul.f32 %v850_v62, %v327_v45  ;;  %v475_v0 = vpop.f32.mrb[7].mxu1 }
 0x2c1   :  { %v1239_v1 = vmul.f32 %v475_v0, %v327_v45 }
 0x2c2   :  { %v591_v2 = vsel %vm494_vm2, %v485_v63, -inf  ;;  %v1263_v11 = vadd.f32 %v485_v63, %v408_v57 }
 0x2c3   :  { %592 = vmax.xlane.f32.xlu0 %v591_v2  ;;  %v1244_v3 = vadd.f32 %v1239_v1, %v1234_v59  ;;  %v602_v7 = vsel %vm494_vm2, %v1239_v1, -inf }
 0x2c4   :  { %v675_v13 = vsel %vm494_vm2, %v1263_v11, -inf }
 0x2c5   :  { %v686_v5 = vsel %vm494_vm2, %v1244_v3, -inf }
 0x2c6   :  { %687 = vmax.xlane.f32.xlu1 %v686_v5 }
 0x2c7   :  { %603 = vmax.xlane.f32.xlu0 %v602_v7 }
 0x2ca   :  { %729 = vmax.xlane.f32.xlu1 %v728_v8 }
 0x2cb   :  { %634 = vmax.xlane.f32.xlu0 %v633_v10 }
 0x2ce   :  { %718 = vmax.xlane.f32.xlu1 %v717_v12 }
 0x2cf   :  { %676 = vmax.xlane.f32.xlu0 %v675_v13 }
 0x330   :  { %v1269_v14 = vpop.xlane.xlu1 %645 }
 0x331   :  { %v647_v15 = vsub.f32 %v1225_v47, %v1269_v14 }
 0x333   :  { %v648_v16 = vmul.f32 1.442695, %v647_v15 }
 0x334   :  { %v1273_v17 = vpop.xlane.xlu1 %561 }
 0x335   :  { %928 = vpow2.f32 %v648_v16  ;;  %v563_v18 = vsub.f32 %v1227_v49, %v1273_v17  ;;  %v551_v19 = vpop.xlane.xlu0 %550 }
 0x336   :  { %v552_v20 = vsub.f32 %v330_v53, %v551_v19 }
 0x337   :  { %v564_v21 = vmul.f32 1.442695, %v563_v18 }
 0x338   :  { %v553_v22 = vmul.f32 1.442695, %v552_v20  ;;  %v498_v20 = vlaneseq }
 0x339   :  { %930 = vpow2.f32 %v564_v21 }
 0x33a   :  { %932 = vpow2.f32 %v553_v22  ;;  %v499_v22 = vshrl.u32 %v498_v20, 7 }
 0x33f   :  { %v929_v23 = vpop.eup %928 }
 0x340   :  { %v507_v24 = vpop.xlane.xlu1 %506  ;;  %v650_v25 = vsel %vm494_vm2, %v929_v23, 0.0  ;;  %v501_v23 = vand.u32 127, %v498_v20 }
 0x341   :  { %v508_v26 = vsub.f32 %v408_v57, %v507_v24  ;;  %v1278_v27 = vpop.xlane.xlu0 %517  ;;  %651 = vadd.xlane.f32.xlu1 %v650_v25 }
 0x342   :  { %v519_v28 = vsub.f32 %v1234_v59, %v1278_v27  ;;  %vm502_vm3 = vcmp.eq.s32.totalorder %v499_v22, %v501_v23 }
 0x343   :  { %v931_v29 = vpop.eup %930  ;;  %v509_v30 = vmul.f32 1.442695, %v508_v26 }
 0x344   :  { %v1282_v31 = vpop.eup %932  ;;  %v520_v32 = vmul.f32 1.442695, %v519_v28  ;;  %v566_v33 = vsel %vm494_vm2, %v931_v29, 0.0 }
 0x345   :  { %934 = vpow2.f32 %v509_v30  ;;  %567 = vadd.xlane.f32.xlu1 %v566_v33  ;;  %v555_v34 = vsel %vm494_vm2, %v1282_v31, 0.0  ;;  %v1328_v30 = vsel %vm502_vm3, 1.0, %v1016_v38 }
 0x346   :  { %936 = vpow2.f32 %v520_v32  ;;  %556 = vadd.xlane.f32.xlu0 %v555_v34 }
 0x34f   :  { %v1287_v35 = vpop.eup %934 }
 0x350   :  { %v937_v36 = vpop.eup %936  ;;  %v593_v37 = vpop.xlane.xlu0 %592  ;;  %v511_v39 = vsel %vm494_vm2, %v1287_v35, 0.0 }
 0x351   :  { %v594_v40 = vsub.f32 %v485_v63, %v593_v37  ;;  %512 = vadd.xlane.f32.xlu1 %v511_v39  ;;  %v522_v41 = vsel %vm494_vm2, %v937_v36, 0.0 }
 0x352   :  { %523 = vadd.xlane.f32.xlu0 %v522_v41 }
 0x353   :  { %v595_v42 = vmul.f32 1.442695, %v594_v40  ;;  %v1292_v43 = vpop.xlane.xlu1 %687 }
 0x354   :  { %v689_v44 = vsub.f32 %v1244_v3, %v1292_v43  ;;  %v1296_v45 = vpop.xlane.xlu0 %603 }
 0x355   :  { %938 = vpow2.f32 %v595_v42  ;;  %v605_v46 = vsub.f32 %v1239_v1, %v1296_v45 }
 0x356   :  { %v690_v48 = vmul.f32 1.442695, %v689_v44 }
 0x357   :  { %v606_v50 = vmul.f32 1.442695, %v605_v46  ;;  %v1300_v51 = vpop.xlane.xlu1 %729 }
 0x358   :  { %940 = vpow2.f32 %v690_v48  ;;  %v731_v52 = vsub.f32 %v1252_v6, %v1300_v51  ;;  %v635_v53 = vpop.xlane.xlu0 %634 }
 0x359   :  { %942 = vpow2.f32 %v606_v50  ;;  %v636_v54 = vsub.f32 %v1246_v4, %v635_v53 }
 0x35a   :  { %v732_v55 = vmul.f32 1.442695, %v731_v52 }
 0x35b   :  { %v637_v56 = vmul.f32 1.442695, %v636_v54  ;;  %v719_v57 = vpop.xlane.xlu1 %718 }
 0x35c   :  { %944 = vpow2.f32 %v732_v55  ;;  %v720_v58 = vsub.f32 %v1259_v9, %v719_v57  ;;  %v677_v60 = vpop.xlane.xlu0 %676 }
 0x35d   :  { %946 = vpow2.f32 %v637_v56  ;;  %v678_v61 = vsub.f32 %v1263_v11, %v677_v60 }
 0x35e   :  { %v721_v62 = vmul.f32 1.442695, %v720_v58 }
 0x35f   :  { %v1307_v63 = vpop.eup %938  ;;  %v679_v0 = vmul.f32 1.442695, %v678_v61 }
 0x360   :  { %948 = vpow2.f32 %v721_v62  ;;  %v597_v2 = vsel %vm494_vm2, %v1307_v63, 0.0 }
 0x361   :  { %950 = vpow2.f32 %v679_v0  ;;  %598 = vadd.xlane.f32.xlu0 %v597_v2 }
 0x362   :  { %v941_v4 = vpop.eup %940 }
 0x363   :  { %v943_v5 = vpop.eup %942  ;;  %v692_v7 = vsel %vm494_vm2, %v941_v4, 0.0 }
 0x364   :  { %693 = vadd.xlane.f32.xlu1 %v692_v7  ;;  %v608_v8 = vsel %vm494_vm2, %v943_v5, 0.0 }
 0x365   :  { %609 = vadd.xlane.f32.xlu0 %v608_v8 }
 0x366   :  { %v945_v9 = vpop.eup %944 }
 0x367   :  { %v1313_v10 = vpop.eup %946  ;;  %v734_v11 = vsel %vm494_vm2, %v945_v9, 0.0 }
 0x368   :  { %735 = vadd.xlane.f32.xlu1 %v734_v11  ;;  %v639_v12 = vsel %vm494_vm2, %v1313_v10, 0.0 }
 0x369   :  { %640 = vadd.xlane.f32.xlu0 %v639_v12 }
 0x36a   :  { %v1318_v13 = vpop.eup %948 }
 0x36b   :  { %v1320_v15 = vpop.eup %950  ;;  %v723_v16 = vsel %vm494_vm2, %v1318_v13, 0.0 }
 0x36c   :  { %724 = vadd.xlane.f32.xlu1 %v723_v16  ;;  %v681_v18 = vsel %vm494_vm2, %v1320_v15, 0.0 }
 0x36d   :  { %682 = vadd.xlane.f32.xlu0 %v681_v18 }
 0x3ce   :  { %v652_v19 = vpop.xlane.xlu1 %651 }
 0x3cf   :  { %952 = vlog2.f32 %v652_v19 }
 0x3d2   :  { %v568_v21 = vpop.xlane.xlu1 %567 }
 0x3d3   :  { %954 = vlog2.f32 %v568_v21  ;;  %v557_v26 = vpop.xlane.xlu0 %556 }
 0x3d9   :  { %v953_v24 = vpop.eup %952 }
 0x3da   :  { %v654_v25 = vmul.f32 0.6931472, %v953_v24 }
 0x3dc   :  { %v655_v28 = vadd.f32 %v654_v25, %v1269_v14 }
 0x3dd   :  { %v955_v29 = vpop.eup %954 }
 0x3de   :  { %v570_v32 = vmul.f32 0.6931472, %v955_v29  ;;  %v656_v33 = vsub.f32 %v1225_v47, %v655_v28  ;;  %v513_v44 = vpop.xlane.xlu1 %512 }
 0x3df   :  { %v524_v34 = vpop.xlane.xlu0 %523 }
 0x3e0   :  { %v571_v36 = vadd.f32 %v570_v32, %v1273_v17  ;;  %956 = vlog2.f32 %v524_v34  ;;  %v662_v37 = vmul.f32 %v1328_v30, %v656_v33 }
 0x3e2   :  { %v663_v39 = vsel %vm494_vm2, %v662_v37, 0.0  ;;  %v572_v40 = vsub.f32 %v1227_v49, %v571_v36 }
 0x3e3   :  { %664 = vadd.xlane.f32.xlu1 %v663_v39 }
 0x3e4   :  { %v578_v14 = vmul.f32 %v1328_v30, %v572_v40 }
 0x3e6   :  { %v579_v41 = vsel %vm494_vm2, %v578_v14, 0.0  ;;  %v540_v14 = vstv %s535_s27 }
 0x3e7   :  { %580 = vadd.xlane.f32.xlu1 %v579_v41 }
 0x3ea   :  { %v957_v38 = vpop.eup %956 }
 0x3eb   :  { %v526_v42 = vmul.f32 0.6931472, %v957_v38 }
 0x3ed   :  { %v527_v47 = vadd.f32 %v526_v42, %v1278_v27 }
 0x3ee   :  { %v599_v46 = vpop.xlane.xlu0 %598 }
 0x3ef   :  { %v528_v17 = vsub.f32 %v1234_v59, %v527_v47 }
 0x3f1   :  { %v694_v48 = vpop.xlane.xlu1 %693  ;;  %v536_v50 = vmul.f32 %v1328_v30, %v528_v17 }
 0x3f2   :  { %958 = vlog2.f32 %v694_v48  ;;  %v610_v52 = vpop.xlane.xlu0 %609 }
 0x3f3   :  { %960 = vlog2.f32 %v610_v52  ;;  %v537_v49 = vsel %vm494_vm2, %v536_v50, 0.0 }
 0x3f4   :  { %538 = vadd.xlane.f32.xlu1 %v537_v49  ;;  %962 = vrcp.f32 %v557_v26 }
 0x3f5   :  { %v736_v53 = vpop.xlane.xlu1 %735 }
 0x3f6   :  { %964 = vlog2.f32 %v736_v53  ;;  %v641_v54 = vpop.xlane.xlu0 %640 }
 0x3f7   :  { %966 = vrcp.f32 %v641_v54 }
 0x3f8   :  { %968 = vrcp.f32 %v513_v44 }
 0x3f9   :  { %970 = vrcp.f32 %v599_v46  ;;  %v725_v4 = vpop.xlane.xlu1 %724 }
 0x3fa   :  { %v683_v59 = vpop.xlane.xlu0 %682 }
 0x3fb   :  { %972 = vrcp.f32 %v683_v59 }
 0x3fc   :  { %v959_v55 = vpop.eup %958  ;;  %974 = vrcp.f32 %v725_v4 }
 0x3fd   :  { %v961_v27 = vpop.eup %960  ;;  %v696_v56 = vmul.f32 0.6931472, %v959_v55 }
 0x3fe   :  { %v612_v57 = vmul.f32 0.6931472, %v961_v27  ;;  %v963_v58 = vpop.eup %962 }
 0x3ff   :  { %v697_v60 = vadd.f32 %v696_v56, %v1292_v43  ;;  %v559_v11 = vmul.f32 %v963_v58, %v1282_v31 }
 0x400   :  { %v965_v61 = vpop.eup %964  ;;  %v613_v62 = vadd.f32 %v612_v57, %v1296_v45 }
 0x401   :  { %v967_v0 = vpop.eup %966  ;;  %v738_v2 = vmul.f32 0.6931472, %v965_v61  ;;  %v698_v8 = vsub.f32 %v1244_v3, %v697_v60  ;;  %v573_v45 = vmul.f32 %v572_v40, %v559_v11  ;;  %v533_v40 = vstv %s786_s26 }
 0x402   :  { %v643_v5 = vmul.f32 %v967_v0, %v1313_v10  ;;  %v614_v7 = vsub.f32 %v1239_v1, %v613_v62  ;;  %v969_v16 = vpop.eup %968 }
 0x403   :  { %v739_v9 = vadd.f32 %v738_v2, %v1300_v51  ;;  %v704_v10 = vmul.f32 %v1328_v30, %v698_v8  ;;  %v515_v51 = vmul.f32 %v969_v16, %v1287_v35  ;;  %v971_v20 = vpop.eup %970  ;;  %v574_v31 = vsel %vm494_vm2, %v573_v45, 0.0 }
 0x404   :  { %v657_v12 = vmul.f32 %v656_v33, %v643_v5  ;;  %v620_v43 = vmul.f32 %v1328_v30, %v614_v7  ;;  %v601_v25 = vmul.f32 %v971_v20, %v1307_v63 }
 0x405   :  { %v740_v1 = vsub.f32 %v1252_v6, %v739_v9  ;;  %v705_v21 = vsel %vm494_vm2, %v704_v10, 0.0  ;;  %v529_v22 = vmul.f32 %v528_v17, %v515_v51  ;;  %v973_v24 = vpop.eup %972 }
 0x406   :  { %v658_v18 = vsel %vm494_vm2, %v657_v12, 0.0  ;;  %v621_v19 = vsel %vm494_vm2, %v620_v43, 0.0  ;;  %v615_v29 = vmul.f32 %v614_v7, %v601_v25  ;;  %v685_v35 = vmul.f32 %v973_v24, %v1320_v15  ;;  %v975_v32 = vpop.eup %974 }
 0x407   :  { %659 = vadd.xlane.f32.xlu0 %v658_v18  ;;  %622 = vadd.xlane.f32.xlu1 %v621_v19  ;;  %v746_v23 = vmul.f32 %v1328_v30, %v740_v1  ;;  %v530_v26 = vsel %vm494_vm2, %v529_v22, 0.0  ;;  %v727_v30 = vmul.f32 %v975_v32, %v1318_v13 }
 0x408   :  { %v616_v33 = vsel %vm494_vm2, %v615_v29, 0.0  ;;  %v699_v34 = vmul.f32 %v698_v8, %v685_v35 }
 0x409   :  { %v747_v28 = vsel %vm494_vm2, %v746_v23, 0.0  ;;  %v741_v37 = vmul.f32 %v740_v1, %v727_v30 }
 0x40a   :  { %v700_v36 = vsel %vm494_vm2, %v699_v34, 0.0 }
 0x40b   :  { %575 = vadd.xlane.f32.xlu0 %v574_v31  ;;  %706 = vadd.xlane.f32.xlu1 %v705_v21  ;;  %v742_v63 = vsel %vm494_vm2, %v741_v37, 0.0 }
 0x40f   :  { %531 = vadd.xlane.f32.xlu0 %v530_v26  ;;  %748 = vadd.xlane.f32.xlu1 %v747_v28 }
 0x413   :  { %617 = vadd.xlane.f32.xlu0 %v616_v33 }
 0x417   :  { %701 = vadd.xlane.f32.xlu0 %v700_v36 }
 0x41b   :  { %743 = vadd.xlane.f32.xlu0 %v742_v63 }
 0x431   :  { %491 = vrot.lane.b32.xlu0 %v1252_v6, %s1017_s2 }
 0x470   :  { %v665_v15 = vpop.xlane.xlu1 %664 }
 0x471   :  { %v666_v42 = vmul.f32 %v665_v15, %v540_v14 }
 0x474   :  { %v581_v39 = vpop.xlane.xlu1 %580 }
 0x475   :  { %v582_v46 = vmul.f32 %v581_v39, %v540_v14 }
 0x481   :  { %v539_v38 = vpop.xlane.xlu1 %538 }
 0x482   :  { %v541_v53 = vmul.f32 %v540_v14, %v539_v38 }
 0x494   :  { %v660_v41 = vpop.xlane.xlu0 %659  ;;  %v623_v17 = vpop.xlane.xlu1 %622 }
 0x495   :  { %v661_v13 = vmul.f32 %v660_v41, %v533_v40  ;;  %v624_v58 = vmul.f32 %v623_v17, %v540_v14 }
 0x497   :  { %v667_v44 = vadd.f32 %v666_v42, %v661_v13 }
 0x498   :  { %v576_v47 = vpop.xlane.xlu0 %575  ;;  %v707_v27 = vpop.xlane.xlu1 %706 }
 0x499   :  { %v577_v48 = vmul.f32 %v576_v47, %v533_v40  ;;  %v668_v52 = vrot.slane %v667_v44, 4  ;;  %v708_v8 = vmul.f32 %v707_v27, %v540_v14 }
 0x49b   :  { %v583_v50 = vadd.f32 %v582_v46, %v577_v48  ;;  %v669_v57 = vadd.f32 %v668_v52, %v667_v44 }
 0x49c   :  { %v532_v49 = vpop.xlane.xlu0 %531  ;;  %v749_v11 = vpop.xlane.xlu1 %748 }
 0x49d   :  { %v584_v6 = vrot.slane %v583_v50, 4  ;;  %v534_v54 = vmul.f32 %v533_v40, %v532_v49  ;;  %v670_v4 = vrot.slane %v669_v57, 2  ;;  %v750_v1 = vmul.f32 %v749_v11, %v540_v14 }
 0x49f   :  { %v585_v55 = vadd.f32 %v584_v6, %v583_v50  ;;  %v542_v56 = vadd.f32 %v541_v53, %v534_v54  ;;  %v671_v19 = vadd.f32 %v670_v4, %v669_v57 }
 0x4a0   :  { %v618_v59 = vpop.xlane.xlu0 %617 }
 0x4a1   :  { %v586_v60 = vrot.slane %v585_v55, 2  ;;  %v543_v61 = vrot.slane %v542_v56, 4  ;;  %v619_v62 = vmul.f32 %v618_v59, %v533_v40  ;;  %v672_v28 = vrot.slane %v671_v19, 1 }
 0x4a3   :  { %v544_v0 = vadd.f32 %v543_v61, %v542_v56  ;;  %v625_v2 = vadd.f32 %v624_v58, %v619_v62  ;;  %v587_v5 = vadd.f32 %v586_v60, %v585_v55  ;;  %v673_v39 = vadd.f32 %v672_v28, %v671_v19 }
 0x4a4   :  { %v702_v7 = vpop.xlane.xlu0 %701 }
 0x4a5   :  { %v545_v9 = vrot.slane %v544_v0, 2  ;;  %v626_v12 = vrot.slane %v625_v2, 4  ;;  %v703_v43 = vmul.f32 %v702_v7, %v533_v40  ;;  %v588_v10 = vrot.slane %v587_v5, 1 }
 0x4a7   :  { %v546_v16 = vadd.f32 %v545_v9, %v544_v0  ;;  %v627_v45 = vadd.f32 %v626_v12, %v625_v2  ;;  %v709_v18 = vadd.f32 %v708_v8, %v703_v43  ;;  %v589_v35 = vadd.f32 %v588_v10, %v587_v5 }
 0x4a8   :  { %v744_v51 = vpop.xlane.xlu0 %743 }
 0x4a9   :  { %v547_v20 = vrot.slane %v546_v16, 1  ;;  %v628_v31 = vrot.slane %v627_v45, 2  ;;  %v710_v21 = vrot.slane %v709_v18, 4  ;;  %v745_v22 = vmul.f32 %v744_v51, %v533_v40 }
 0x4ab   :  { %v548_v23 = vadd.f32 %v547_v20, %v546_v16  ;;  %v629_v24 = vadd.f32 %v628_v31, %v627_v45  ;;  %v711_v25 = vadd.f32 %v710_v21, %v709_v18  ;;  %v751_v26 = vadd.f32 %v750_v1, %v745_v22 }
 0x4ac   :  { %v492_v29 = vpop.permute.xlu0 %491 }
 0x4ad   :  { %v630_v32 = vrot.slane %v629_v24, 1  ;;  %v712_v33 = vrot.slane %v711_v25, 2  ;;  %v752_v34 = vrot.slane %v751_v26, 4  ;;  %v495_v30 = vsel %vm494_vm2, %v1244_v3, %v492_v29 }
 0x4ae   :  { %v590_v36 = vadd.f32 %v589_v35, %v548_v23  ;;  %497 = vst.msk [vmem:[%s1388_s5] sm:$0xff] %vm496_vm4, %v495_v30  ;;  %s992_s5 = scalar_lea.vmem %s770_s30, 32 }
 0x4af   :  { %v631_v37 = vadd.f32 %v630_v32, %v629_v24  ;;  %v713_v63 = vadd.f32 %v712_v33, %v711_v25  ;;  %v753_v15 = vadd.f32 %v752_v34, %v751_v26  ;;  %p994_p7 = scmp.lt.s32.totalorder %s992_s5, %s988_s7 }
 0x4b1   :  { %v714_v40 = vrot.slane %v713_v63, 1  ;;  %v754_v14 = vrot.slane %v753_v15, 2  ;;  %v632_v41 = vadd.f32 %v631_v37, %v590_v36  ;;  %p995_p8 = por %p994_p7, %p993_p6 }
 0x4b3   :  { %v755_v38 = vadd.f32 %v754_v14, %v753_v15  ;;  %v674_v13 = vadd.f32 %v673_v39, %v632_v41  ;;  %v715_v42 = vadd.f32 %v714_v40, %v713_v63  ;;  %p996_p9 = pnand %p995_p8, %p989_p5 }
 0x4b5   :  { %v756_v44 = vrot.slane %v755_v38, 1  ;;  %v716_v47 = vadd.f32 %v715_v42, %v674_v13 }
 0x4b7   :  { %v757_v46 = vadd.f32 %v756_v44, %v755_v38 }
 0x4b9   :  { %v758_v17 = vadd.f32 %v757_v46, %v716_v47 }
 0x4bb   :  { %v759_v3 = vsub.f32 0.0, %v758_v17 }
 0x4bd   :  { %v760_v48 = vmul.f32 0.020833334, %v759_v3 }
 0x4bf   :  { %762 = vst.msk [vmem:[#allocation5] sm:$0x1] %vm761_vm5, %v760_v48 }
 0x4c0   :  { %999 = shalt.err (!%p996_p9)
}
 0x4c1   :  { %s1000_s10 = scalar_lea.hbm %s1387_s4, 16 }
 0x4c2   :  { %p1001_p10 = scmp.ne.s32.totalorder %s1387_s4, %s1000_s10  ;;  %p1004_p11 = scmp.lt.u32.totalorder %s1000_s10, %s1387_s4 }
 0x4c4   :  { %p1006_p12 = pnand %p1004_p11, %p1001_p10 }
 0x4c6   :  { %1009 = shalt.err (!%p1006_p12)
}
 0x4c7   :  { %772 = dma.vmem_to_hbm [thread:$0]  %s770_s30, 16, %s1387_s4, [#allocation3]  }
 0x4c8   :  { %1012 = dma.done.wait [#allocation3], 16  }
 0x4c9   :  { %1013 = vsyncadd [#allocation3], 4294967280 }
 0x4ca   :  { %784 = vsyncpa [#allocation3], 1 }
 0x4cb   :  { %785 = vsyncpa [#allocation4], 1 }

// kernel: tmmf_forward.5
= control target key start
LH: loop header
LB: loop body
LE: loop exit
PB: predicated region body
PF: predicated region fallthrough
CT: control target
= control target key end

     0   :  { %vm40_vm0 = vcmask 261120   ;;  %vm252_vm1 = vcmask 523264   ;;  %v665_v39 = vmov 0   ;;  %vm487_vm12 = vcmask 7168   ;;  %s971_s3 = inlined_call_operand.vmem [shape: f32[32,64], index: 3, kind: input, shape index: {}]   ;;  %s972_s2 = inlined_call_operand.vmem [shape: f32[64,32], index: 2, kind: input, shape index: {}]   ;;  %s973_s4 = inlined_call_operand.vmem [shape: f32[1,64], index: 4, kind: input, shape index: {}]   ;;  %s974_s5 = inlined_call_operand.vmem [shape: s32[64,1], index: 5, kind: input, shape index: {}]   ;;  %s975_s0 = inlined_call_operand.vmem [shape: f32[24,32], index: 0, kind: input, shape index: {}]   ;;  %s976_s1 = inlined_call_operand.vmem [shape: f32[1,32], index: 1, kind: input, shape index: {}]   ;;  %s977_s6 = inlined_call_operand.<no memory space> [shape: f32[1], index: 6, kind: input, shape index: {}]   ;;  %s978_s7 = inlined_call_operand.vmem [shape: f32[1,2], index: 7, kind: output, shape index: {}]  }
   0x1   :  { %v112_v0 = vld [vmem:[%s971_s3] sm:$0xff]  ;;  %v113_v1 = vld [vmem:[%s971_s3 + $0x8] sm:$0xff]  ;;  %v114_v2 = vld [vmem:[%s971_s3 + $0x10] sm:$0xff]  ;;  %618 = vset.pattern.permute.xlu1 %v665_v39  ;;  %617 = vset.pattern.permute.xlu0 %v665_v39 }
   0x2   :  { %v602_v3 = vpack.c.bf16 %v113_v1, %v112_v0  ;;  %v115_v4 = vld [vmem:[%s971_s3 + $0x18] sm:$0xff]  ;;  %v104_v5 = vld [vmem:[%s972_s2] sm:$0xff]  ;;  %v105_v8 = vld [vmem:[%s972_s2 + $0x8] sm:$0xff] }
   0x3   :  { %v606_v6 = vpack.c.bf16 %v115_v4, %v114_v2  ;;  %590 = vmatprep.mubr.msk.f32.mxu0 %vm40_vm0, %v104_v5  ;;  %v108_v7 = vld [vmem:[%s972_s2 + $0x20] sm:$0xff]  ;;  %v109_v9 = vld [vmem:[%s972_s2 + $0x28] sm:$0xff]  ;;  %v106_v10 = vld [vmem:[%s972_s2 + $0x10] sm:$0xff] }
   0x4   :  { %603 = vmatprep.subr.bf16.mxu0 %v602_v3  ;;  %610 = vmatprep.subr.bf16.mxu1 %v602_v3  ;;  %v110_v11 = vld [vmem:[%s972_s2 + $0x30] sm:$0xff]  ;;  %v107_v12 = vld [vmem:[%s972_s2 + $0x18] sm:$0xff]  ;;  %v545_v14 = vld [vmem:[%s973_s4] ss:$0 sm:$0xff] }
   0x5   :  { %605 = vmatpush3.bf16.msra.mxu0 %v602_v3  ;;  %612 = vmatpush3.bf16.msra.mxu1 %v602_v3  ;;  %v111_v13 = vld [vmem:[%s972_s2 + $0x38] sm:$0xff] }
   0x6   :  { %607 = vmatprep.subr.bf16.mxu0 %v606_v6  ;;  %611 = vmatprep.subr.bf16.mxu1 %v606_v6 }
   0x7   :  { %596 = vmatprep.mubr.msk.f32.mxu1 %vm40_vm0, %v108_v7 }
   0x9   :  { %609 = vmatpush3.bf16.msra.mxu0 %v606_v6  ;;  %613 = vmatpush3.bf16.msra.mxu1 %v606_v6 }
   0xc   :  { %591 = vmatmul.mubr.msk.f32.vlgmr.msra.gmra.mrb[0].mxu0 %vm40_vm0, %v105_v8  ;;  %597 = vmatmul.mubr.msk.f32.vlgmr.msra.gmra.mrb[0].mxu1 %vm40_vm0, %v109_v9 }
   0xd   :  { %593 = vmatprep.mubr.msk.f32.mxu0 %vm40_vm0, %v106_v10  ;;  %599 = vmatprep.mubr.msk.f32.mxu1 %vm40_vm0, %v110_v11 }
  0x10   :  { %594 = vmatmul.mubr.msk.f32.gmra.mrb[2].mxu0 %vm40_vm0, %v107_v12  ;;  %600 = vmatmul.mubr.msk.f32.gmra.mrb[2].mxu1 %vm40_vm0, %v111_v13 }
  0xdf   :  { %v592_v15 = vpop.f32.mrb[0].mxu0  ;;  %v598_v16 = vpop.f32.mrb[0].mxu1 }
  0xe0   :  { %v213_v17 = vpop.f32.mrb[1].mxu0  ;;  %v233_v18 = vpop.f32.mrb[1].mxu1  ;;  %v757_v20 = vadd.f32 %v592_v15, %v545_v14  ;;  %v771_v31 = vadd.f32 %v598_v16, %v545_v14  ;;  %v830_v16 = vld [vmem:[%s974_s5 + $0x8] sm:$0xff] }
  0xe1   :  { %v755_v19 = vadd.f32 %v545_v14, %v213_v17  ;;  %v763_v27 = vadd.f32 %v545_v14, %v233_v18  ;;  %v835_v17 = vld [vmem:[%s974_s5] sm:$0xff]  ;;  %v841_v18 = vld [vmem:[%s974_s5 + $0x10] sm:$0xff]  ;;  %vm456_vm10 = vcmp.ne.s32.totalorder %v830_v16, 0 }
  0xe2   :  { %v256_v30 = vsel %vm252_vm1, %v757_v20, -inf  ;;  %v268_v36 = vsel %vm252_vm1, %v771_v31, -inf  ;;  %vm455_vm11 = vcmp.ne.s32.totalorder %v835_v17, 0  ;;  %vm457_vm13 = vcmp.ne.s32.totalorder %v841_v18, 0 }
  0xe3   :  { %v595_v21 = vpop.f32.mrb[2].mxu0  ;;  %v253_v22 = vsel %vm252_vm1, %v755_v19, -inf  ;;  %v601_v23 = vpop.f32.mrb[2].mxu1  ;;  %v265_v33 = vsel %vm252_vm1, %v763_v27, -inf }
  0xe4   :  { %v223_v24 = vpop.f32.mrb[3].mxu0  ;;  %254 = vmax.xlane.f32.xlu0 %v253_v22  ;;  %v243_v25 = vpop.f32.mrb[3].mxu1  ;;  %v765_v28 = vadd.f32 %v595_v21, %v545_v14  ;;  %v779_v35 = vadd.f32 %v601_v23, %v545_v14  ;;  %v848_v21 = vld [vmem:[%s974_s5 + $0x18] sm:$0xff]  ;;  %v854_v22 = vld [vmem:[%s974_s5 + $0x20] sm:$0xff]  ;;  %v860_v23 = vld [vmem:[%s974_s5 + $0x28] sm:$0xff] }
  0xe5   :  { %v761_v26 = vadd.f32 %v545_v14, %v223_v24  ;;  %v773_v32 = vadd.f32 %v545_v14, %v243_v25  ;;  %v866_v24 = vld [vmem:[%s974_s5 + $0x30] sm:$0xff]  ;;  %v872_v25 = vld [vmem:[%s974_s5 + $0x38] sm:$0xff]  ;;  %vm458_vm14 = vcmp.ne.s32.totalorder %v848_v21, 0  ;;  %vm459_vm15 = vcmp.ne.s32.totalorder %v854_v22, 0 }
  0xe6   :  { %v262_v34 = vsel %vm252_vm1, %v765_v28, -inf  ;;  %v274_v38 = vsel %vm252_vm1, %v779_v35, -inf }
  0xe7   :  { %v259_v29 = vsel %vm252_vm1, %v761_v26, -inf  ;;  %v271_v37 = vsel %vm252_vm1, %v773_v32, -inf }
  0xe8   :  { %260 = vmax.xlane.f32.xlu1 %v259_v29  ;;  %257 = vmax.xlane.f32.xlu0 %v256_v30 }
  0xec   :  { %263 = vmax.xlane.f32.xlu1 %v262_v34  ;;  %266 = vmax.xlane.f32.xlu0 %v265_v33 }
  0xf0   :  { %269 = vmax.xlane.f32.xlu1 %v268_v36  ;;  %272 = vmax.xlane.f32.xlu0 %v271_v37 }
  0xf4   :  { %275 = vmax.xlane.f32.xlu1 %v274_v38 }
 0x171   :  { %v787_v40 = vpop.xlane.xlu0 %254 }
 0x172   :  { %v277_v41 = vsub.f32 %v755_v19, %v787_v40 }
 0x174   :  { %v285_v42 = vmul.f32 1.442695, %v277_v41 }
 0x175   :  { %v791_v43 = vpop.xlane.xlu1 %260  ;;  %v793_v44 = vpop.xlane.xlu0 %257 }
 0x176   :  { %619 = vpow2.f32 %v285_v42  ;;  %v278_v45 = vsub.f32 %v757_v20, %v793_v44  ;;  %v279_v47 = vsub.f32 %v761_v26, %v791_v43  ;;  %v365_v42 = vlaneseq }
 0x178   :  { %v287_v46 = vmul.f32 1.442695, %v278_v45  ;;  %v289_v53 = vmul.f32 1.442695, %v279_v47 }
 0x179   :  { %v799_v48 = vpop.xlane.xlu1 %263  ;;  %v801_v49 = vpop.xlane.xlu0 %266 }
 0x17a   :  { %v281_v50 = vsub.f32 %v763_v27, %v801_v49  ;;  %621 = vpow2.f32 %v287_v46  ;;  %v280_v51 = vsub.f32 %v765_v28, %v799_v48 }
 0x17c   :  { %v293_v52 = vmul.f32 1.442695, %v281_v50  ;;  %v291_v59 = vmul.f32 1.442695, %v280_v51  ;;  %v876_v51 = vand.u32 127, %v365_v42 }
 0x17d   :  { %v807_v54 = vpop.xlane.xlu1 %269  ;;  %v809_v55 = vpop.xlane.xlu0 %272 }
 0x17e   :  { %v282_v56 = vsub.f32 %v771_v31, %v807_v54  ;;  %v283_v57 = vsub.f32 %v773_v32, %v809_v55  ;;  %623 = vpow2.f32 %v293_v52 }
 0x17f   :  { %625 = vpow2.f32 %v289_v53 }
 0x180   :  { %v620_v58 = vpop.eup %619  ;;  %v295_v60 = vmul.f32 1.442695, %v282_v56  ;;  %v297_v61 = vmul.f32 1.442695, %v283_v57 }
 0x181   :  { %v815_v62 = vpop.xlane.xlu1 %275  ;;  %v301_v63 = vsel %vm252_vm1, %v620_v58, 0.0 }
 0x182   :  { %627 = vpow2.f32 %v295_v60  ;;  %v284_v0 = vsub.f32 %v779_v35, %v815_v62  ;;  %302 = vadd.xlane.f32.xlu0 %v301_v63 }
 0x183   :  { %629 = vpow2.f32 %v291_v59 }
 0x184   :  { %v299_v1 = vmul.f32 1.442695, %v284_v0  ;;  %v622_v2 = vpop.eup %621  ;;  %631 = vpow2.f32 %v297_v61  ;;  %v666_v61 = vmov 0.0  }
 0x185   :  { %v304_v3 = vsel %vm252_vm1, %v622_v2, 0.0 }
 0x186   :  { %305 = vadd.xlane.f32.xlu1 %v304_v3  ;;  %633 = vpow2.f32 %v299_v1 }
 0x188   :  { %v624_v4 = vpop.eup %623 }
 0x189   :  { %v313_v5 = vsel %vm252_vm1, %v624_v4, 0.0  ;;  %v626_v6 = vpop.eup %625 }
 0x18a   :  { %314 = vadd.xlane.f32.xlu0 %v313_v5  ;;  %v307_v10 = vsel %vm252_vm1, %v626_v6, 0.0 }
 0x18c   :  { %v628_v7 = vpop.eup %627 }
 0x18d   :  { %v316_v8 = vsel %vm252_vm1, %v628_v7, 0.0  ;;  %v630_v9 = vpop.eup %629 }
 0x18e   :  { %317 = vadd.xlane.f32.xlu1 %v316_v8  ;;  %v632_v11 = vpop.eup %631  ;;  %308 = vadd.xlane.f32.xlu0 %v307_v10  ;;  %v310_v12 = vsel %vm252_vm1, %v630_v9, 0.0 }
 0x18f   :  { %v319_v14 = vsel %vm252_vm1, %v632_v11, 0.0 }
 0x190   :  { %v634_v13 = vpop.eup %633 }
 0x191   :  { %v322_v15 = vsel %vm252_vm1, %v634_v13, 0.0 }
 0x192   :  { %311 = vadd.xlane.f32.xlu1 %v310_v12  ;;  %320 = vadd.xlane.f32.xlu0 %v319_v14 }
 0x196   :  { %323 = vadd.xlane.f32.xlu1 %v322_v15 }
 0x1a7   :  { %371 = vperm.xlu1 %618, %v830_v16  }
 0x1a8   :  { %368 = vperm.xlu0 %617, %v835_v17   ;;  %v565_v17 = vsel %vm458_vm14, 1.0, %v666_v61 }
 0x1ab   :  { %374 = vperm.xlu1 %618, %v841_v18   ;;  %v566_v18 = vsel %vm459_vm15, 1.0, %v666_v61 }
 0x1af   :  { %377 = vperm.xlu1 %618, %v848_v21  }
 0x1b3   :  { %380 = vperm.xlu1 %618, %v854_v22  }
 0x1b7   :  { %383 = vperm.xlu1 %618, %v860_v23  }
 0x1bb   :  { %386 = vperm.xlu1 %618, %v866_v24  }
 0x1bf   :  { %389 = vperm.xlu1 %618, %v872_v25  }
 0x20f   :  { %v303_v29 = vpop.xlane.xlu0 %302 }
 0x210   :  { %635 = vlog2.f32 %v303_v29 }
 0x213   :  { %v306_v30 = vpop.xlane.xlu1 %305 }
 0x214   :  { %637 = vlog2.f32 %v306_v30 }
 0x217   :  { %v315_v33 = vpop.xlane.xlu0 %314 }
 0x21a   :  { %v636_v37 = vpop.eup %635 }
 0x21b   :  { %v318_v34 = vpop.xlane.xlu1 %317  ;;  %v309_v36 = vpop.xlane.xlu0 %308  ;;  %v326_v45 = vmul.f32 0.6931472, %v636_v37 }
 0x21c   :  { %639 = vlog2.f32 %v309_v36 }
 0x21d   :  { %641 = vlog2.f32 %v315_v33  ;;  %v341_v52 = vadd.f32 %v326_v45, %v787_v40 }
 0x21e   :  { %v638_v38 = vpop.eup %637 }
 0x21f   :  { %v312_v39 = vpop.xlane.xlu1 %311  ;;  %v328_v41 = vmul.f32 0.6931472, %v638_v38  ;;  %v321_v50 = vpop.xlane.xlu0 %320 }
 0x220   :  { %643 = vlog2.f32 %v312_v39 }
 0x221   :  { %645 = vlog2.f32 %v318_v34  ;;  %v342_v47 = vadd.f32 %v328_v41, %v793_v44  ;;  %v349_v44 = vsub.f32 %v755_v19, %v341_v52 }
 0x222   :  { %647 = vlog2.f32 %v321_v50  ;;  %v27_v50 = vld [vmem:[%s975_s0] sm:$0xff] }
 0x223   :  { %v324_v46 = vpop.xlane.xlu1 %323  ;;  %v350_v59 = vsub.f32 %v757_v20, %v342_v47 }
 0x224   :  { %649 = vlog2.f32 %v324_v46 }
 0x226   :  { %v640_v53 = vpop.eup %639 }
 0x227   :  { %v372_v56 = vpop.permute.xlu1 %371  ;;  %v330_v57 = vmul.f32 0.6931472, %v640_v53  ;;  %v369_v58 = vpop.permute.xlu0 %368 }
 0x228   :  { %vm392_vm2 = vcmp.eq.s32.totalorder %v876_v51, %v372_v56  ;;  %v642_v60 = vpop.eup %641  ;;  %vm391_vm3 = vcmp.eq.s32.totalorder %v876_v51, %v369_v58 }
 0x229   :  { %v555_v63 = vsel %vm392_vm2, 1.0, %v666_v61  ;;  %v343_v40 = vadd.f32 %v330_v57, %v791_v43  ;;  %v554_v1 = vsel %vm391_vm3, 1.0, %v666_v61  ;;  %v334_v20 = vmul.f32 0.6931472, %v642_v60  ;;  %v28_v60 = vld [vmem:[%s975_s0 + $0x8] sm:$0xff] }
 0x22a   :  { %v644_v0 = vpop.eup %643  ;;  %v416_v2 = vmul.f32 %v555_v63, %v350_v59  ;;  %v415_v5 = vmul.f32 %v554_v1, %v349_v44  ;;  %vm462_vm2 = vcmp.ne.s32.totalorder %v872_v25, 0  ;;  %vm538_vm3 = vcmask 8192  }
 0x22b   :  { %v332_v3 = vmul.f32 0.6931472, %v644_v0  ;;  %v375_v4 = vpop.permute.xlu1 %374  ;;  %v646_v6 = vpop.eup %645  ;;  %v351_v8 = vsub.f32 %v761_v26, %v343_v40  ;;  %v345_v14 = vadd.f32 %v334_v20, %v801_v49 }
 0x22c   :  { %vm393_vm4 = vcmp.eq.s32.totalorder %v876_v51, %v375_v4  ;;  %v426_v7 = vsel %vm252_vm1, %v416_v2, 0.0  ;;  %v423_v43 = vsel %vm252_vm1, %v415_v5, 0.0  ;;  %v336_v11 = vmul.f32 0.6931472, %v646_v6  ;;  %v648_v26 = vpop.eup %647 }
 0x22d   :  { %v344_v19 = vadd.f32 %v332_v3, %v799_v48  ;;  %v556_v9 = vsel %vm393_vm4, 1.0, %v666_v61  ;;  %427 = vadd.xlane.f32.xlu0 %v426_v7  ;;  %424 = vadd.xlane.f32.xlu1 %v423_v43  ;;  %v338_v34 = vmul.f32 0.6931472, %v648_v26  ;;  %v563_v5 = vsel %vm456_vm10, 1.0, %v666_v61 }
 0x22e   :  { %v417_v10 = vmul.f32 %v556_v9, %v351_v8  ;;  %v346_v30 = vadd.f32 %v336_v11, %v807_v54  ;;  %v650_v49 = vpop.eup %649  ;;  %v510_v20 = vsel %vm487_vm12, %v563_v5, 0.0  ;;  %v564_v7 = vsel %vm457_vm13, 1.0, %v666_v61 }
 0x22f   :  { %v378_v12 = vpop.permute.xlu1 %377  ;;  %v352_v13 = vsub.f32 %v765_v28, %v344_v19  ;;  %v353_v28 = vsub.f32 %v763_v27, %v345_v14  ;;  %v347_v42 = vadd.f32 %v338_v34, %v809_v55  ;;  %v340_v45 = vmul.f32 0.6931472, %v650_v49 }
 0x230   :  { %vm394_vm5 = vcmp.eq.s32.totalorder %v876_v51, %v378_v12  ;;  %v429_v15 = vsel %vm252_vm1, %v417_v10, 0.0  ;;  %v354_v41 = vsub.f32 %v771_v31, %v346_v30  ;;  %v544_v31 = vld [vmem:[%s976_s1] ss:$0 sm:$0xff]  ;;  %v512_v16 = vsel %vm487_vm12, %v564_v7, 0.0 }
 0x231   :  { %v557_v48 = vsel %vm394_vm5, 1.0, %v666_v61  ;;  %430 = vadd.xlane.f32.xlu0 %v429_v15  ;;  %v348_v55 = vadd.f32 %v340_v45, %v815_v62  ;;  %v355_v53 = vsub.f32 %v773_v32, %v347_v42  ;;  %v37_v58 = vmul.f32 %v544_v31, %v27_v50  ;;  %v29_v62 = vld [vmem:[%s975_s0 + $0x10] sm:$0xff]  ;;  %s667_s0 = smov 1  }
 0x232   :  { %v418_v29 = vmul.f32 %v557_v48, %v352_v13  ;;  %v38_v1 = vmul.f32 %v544_v31, %v28_v60  ;;  %v39_v2 = vmul.f32 %v544_v31, %v29_v62  ;;  %v514_v9 = vsel %vm487_vm12, %v565_v17, 0.0 }
 0x233   :  { %v381_v33 = vpop.permute.xlu1 %380  ;;  %v356_v32 = vsub.f32 %v779_v35, %v348_v55  ;;  %v41_v40 = vsel %vm40_vm0, %v37_v58, 0.0  ;;  %v562_v35 = vsel %vm455_vm11, 1.0, %v666_v61  ;;  %v516_v10 = vsel %vm487_vm12, %v566_v18, 0.0 }
 0x234   :  { %vm395_vm6 = vcmp.eq.s32.totalorder %v876_v51, %v381_v33  ;;  %v432_v36 = vsel %vm252_vm1, %v418_v29, 0.0  ;;  %v44_v4 = vsel %vm40_vm0, %v38_v1, 0.0  ;;  %v509_v6 = vsel %vm487_vm12, %v562_v35, 0.0 }
 0x235   :  { %v558_v37 = vsel %vm395_vm6, 1.0, %v666_v61  ;;  %433 = vadd.xlane.f32.xlu1 %v432_v36  ;;  %v511_v8 = vadd.f32 %v510_v20, %v509_v6  ;;  %v569_v15 = vsel %vm462_vm2, 1.0, %v666_v61 }
 0x236   :  { %v419_v38 = vmul.f32 %v558_v37, %v353_v28  ;;  %v522_v26 = vsel %vm487_vm12, %v569_v15, 0.0 }
 0x237   :  { %v384_v39 = vpop.permute.xlu1 %383  ;;  %v513_v19 = vadd.f32 %v512_v16, %v511_v8 }
 0x238   :  { %vm396_vm7 = vcmp.eq.s32.totalorder %v876_v51, %v384_v39  ;;  %v435_v54 = vsel %vm252_vm1, %v419_v38, 0.0 }
 0x239   :  { %v559_v46 = vsel %vm396_vm7, 1.0, %v666_v61  ;;  %436 = vadd.xlane.f32.xlu0 %v435_v54  ;;  %v515_v43 = vadd.f32 %v514_v9, %v513_v19 }
 0x23a   :  { %v420_v47 = vmul.f32 %v559_v46, %v354_v41 }
 0x23b   :  { %v387_v27 = vpop.permute.xlu1 %386  ;;  %v517_v21 = vadd.f32 %v516_v10, %v515_v43 }
 0x23c   :  { %vm397_vm8 = vcmp.eq.s32.totalorder %v876_v51, %v387_v27  ;;  %v438_v52 = vsel %vm252_vm1, %v420_v47, 0.0 }
 0x23d   :  { %v560_v56 = vsel %vm397_vm8, 1.0, %v666_v61  ;;  %439 = vadd.xlane.f32.xlu1 %v438_v52 }
 0x23e   :  { %v421_v57 = vmul.f32 %v560_v56, %v355_v53 }
 0x23f   :  { %v390_v59 = vpop.permute.xlu1 %389 }
 0x240   :  { %vm398_vm9 = vcmp.eq.s32.totalorder %v876_v51, %v390_v59  ;;  %v441_v63 = vsel %vm252_vm1, %v421_v57, 0.0  ;;  %v47_v51 = vsel %vm40_vm0, %v39_v2, 0.0  ;;  %vm460_vm0 = vcmp.ne.s32.totalorder %v860_v23, 0 }
 0x241   :  { %v561_v44 = vsel %vm398_vm9, 1.0, %v666_v61  ;;  %442 = vadd.xlane.f32.xlu0 %v441_v63  ;;  %v567_v11 = vsel %vm460_vm0, 1.0, %v666_v61 }
 0x242   :  { %v422_v0 = vmul.f32 %v561_v44, %v356_v32  ;;  %v518_v12 = vsel %vm487_vm12, %v567_v11, 0.0 }
 0x243   :  { %v519_v22 = vadd.f32 %v518_v12, %v517_v21 }
 0x244   :  { %v444_v3 = vsel %vm252_vm1, %v422_v0, 0.0  ;;  %vm461_vm1 = vcmp.ne.s32.totalorder %v866_v24, 0 }
 0x245   :  { %445 = vadd.xlane.f32.xlu1 %v444_v3  ;;  %42 = vadd.xlane.f32.xlu0 %v41_v40  ;;  %v568_v13 = vsel %vm461_vm1, 1.0, %v666_v61 }
 0x246   :  { %v520_v14 = vsel %vm487_vm12, %v568_v13, 0.0 }
 0x247   :  { %v521_v23 = vadd.f32 %v520_v14, %v519_v22 }
 0x249   :  { %45 = vadd.xlane.f32.xlu1 %v44_v4  ;;  %48 = vadd.xlane.f32.xlu0 %v47_v51  ;;  %v523_v48 = vadd.f32 %v522_v26, %v521_v23 }
 0x24b   :  { %v524_v30 = vrot.slane %v523_v48, 4 }
 0x24d   :  { %v525_v28 = vadd.f32 %v524_v30, %v523_v48 }
 0x24f   :  { %v526_v41 = vrot.slane %v525_v28, 2 }
 0x251   :  { %v527_v27 = vadd.f32 %v526_v41, %v525_v28 }
 0x253   :  { %v528_v58 = vrot.slane %v527_v27, 1 }
 0x255   :  { %v529_v40 = vadd.f32 %v528_v58, %v527_v27 }
 0x2ba   :  { %v428_v29 = vpop.xlane.xlu0 %427  ;;  %v425_v33 = vpop.xlane.xlu1 %424 }
 0x2bb   :  { %v447_v34 = vsub.f32 0.0, %v425_v33  ;;  %v448_v36 = vsub.f32 0.0, %v428_v29 }
 0x2bd   :  { %v479_v38 = vmul.f32 %v562_v35, %v447_v34  ;;  %v480_v25 = vmul.f32 %v563_v5, %v448_v36  ;;  %v530_v35 = vmax.f32 %v529_v40, 1.0 }
 0x2be   :  { %v431_v24 = vpop.xlane.xlu0 %430 }
 0x2bf   :  { %v449_v37 = vsub.f32 0.0, %v431_v24  ;;  %v488_v54 = vsel %vm487_vm12, %v479_v38, 0.0  ;;  %v489_v46 = vsel %vm487_vm12, %v480_v25, 0.0  ;;  %651 = vrcp.f32 %v530_v35 }
 0x2c0   :  { %v490_v53 = vadd.f32 %v489_v46, %v488_v54 }
 0x2c1   :  { %v481_v45 = vmul.f32 %v564_v7, %v449_v37 }
 0x2c2   :  { %v434_v49 = vpop.xlane.xlu1 %433 }
 0x2c3   :  { %v450_v39 = vsub.f32 0.0, %v434_v49  ;;  %v491_v31 = vsel %vm487_vm12, %v481_v45, 0.0 }
 0x2c4   :  { %v492_v59 = vadd.f32 %v491_v31, %v490_v53 }
 0x2c5   :  { %v482_v47 = vmul.f32 %v565_v17, %v450_v39 }
 0x2c6   :  { %v437_v42 = vpop.xlane.xlu0 %436 }
 0x2c7   :  { %v451_v61 = vsub.f32 0.0, %v437_v42  ;;  %v493_v56 = vsel %vm487_vm12, %v482_v47, 0.0 }
 0x2c8   :  { %v494_v32 = vadd.f32 %v493_v56, %v492_v59 }
 0x2c9   :  { %v483_v55 = vmul.f32 %v566_v18, %v451_v61  ;;  %v652_v18 = vpop.eup %651 }
 0x2ca   :  { %v440_v50 = vpop.xlane.xlu1 %439 }
 0x2cb   :  { %v452_v52 = vsub.f32 0.0, %v440_v50  ;;  %v495_v62 = vsel %vm487_vm12, %v483_v55, 0.0 }
 0x2cc   :  { %v496_v1 = vadd.f32 %v495_v62, %v494_v32 }
 0x2cd   :  { %v484_v57 = vmul.f32 %v567_v11, %v452_v52  ;;  %v51_v11 = vstv %s977_s6 }
 0x2ce   :  { %v443_v60 = vpop.xlane.xlu0 %442 }
 0x2cf   :  { %v453_v63 = vsub.f32 0.0, %v443_v60  ;;  %v497_v44 = vsel %vm487_vm12, %v484_v57, 0.0 }
 0x2d0   :  { %v498_v51 = vadd.f32 %v497_v44, %v496_v1 }
 0x2d1   :  { %v485_v0 = vmul.f32 %v568_v13, %v453_v63 }
 0x2d2   :  { %v446_v2 = vpop.xlane.xlu1 %445  ;;  %v43_v21 = vpop.xlane.xlu0 %42 }
 0x2d3   :  { %v499_v3 = vsel %vm487_vm12, %v485_v0, 0.0  ;;  %v454_v4 = vsub.f32 0.0, %v446_v2  ;;  %v52_v12 = vadd.f32 %v51_v11, %v43_v21 }
 0x2d4   :  { %v500_v6 = vadd.f32 %v499_v3, %v498_v51 }
 0x2d5   :  { %v486_v5 = vmul.f32 %v569_v15, %v454_v4  ;;  %v65_v22 = vmul.f32 -1.0, %v52_v12 }
 0x2d6   :  { %v46_v13 = vpop.xlane.xlu1 %45  ;;  %v49_v15 = vpop.xlane.xlu0 %48 }
 0x2d7   :  { %v501_v20 = vsel %vm487_vm12, %v486_v5, 0.0  ;;  %v53_v14 = vadd.f32 %v51_v11, %v46_v13  ;;  %v71_v23 = vand.u32 2147483647, %v65_v22  ;;  %v54_v48 = vadd.f32 %v51_v11, %v49_v15 }
 0x2d8   :  { %v502_v7 = vadd.f32 %v501_v20, %v500_v6  ;;  %v68_v61 = vmax.f32 %v65_v22, 0.0 }
 0x2d9   :  { %v72_v26 = vand.u32 2147483647, %v53_v14  ;;  %v74_v29 = vsub.f32 0.0, %v71_v23  ;;  %v73_v33 = vand.u32 2147483647, %v54_v48  ;;  %v69_v46 = vmax.f32 %v53_v14, 0.0 }
 0x2da   :  { %v503_v8 = vrot.slane %v502_v7, 4  ;;  %v70_v55 = vmax.f32 %v54_v48, 0.0 }
 0x2db   :  { %v75_v30 = vsub.f32 0.0, %v72_v26  ;;  %v77_v24 = vmul.f32 1.442695, %v74_v29  ;;  %v76_v36 = vsub.f32 0.0, %v73_v33 }
 0x2dc   :  { %v504_v16 = vadd.f32 %v503_v8, %v502_v7 }
 0x2dd   :  { %v79_v34 = vmul.f32 1.442695, %v75_v30  ;;  %653 = vpow2.f32 %v77_v24  ;;  %v81_v28 = vmul.f32 1.442695, %v76_v36 }
 0x2de   :  { %v505_v17 = vrot.slane %v504_v16, 2 }
 0x2df   :  { %655 = vpow2.f32 %v79_v34 }
 0x2e0   :  { %v506_v19 = vadd.f32 %v505_v17, %v504_v16  ;;  %657 = vpow2.f32 %v81_v28 }
 0x2e2   :  { %v507_v9 = vrot.slane %v506_v19, 1 }
 0x2e4   :  { %v508_v43 = vadd.f32 %v507_v9, %v506_v19 }
 0x2e6   :  { %v532_v10 = vmul.f32 %v652_v18, %v508_v43 }
 0x2e7   :  { %v654_v49 = vpop.eup %653 }
 0x2e8   :  { %534 = vrot.lane.b32.xlu1 %v532_v10, %s667_s0  ;;  %v83_v38 = vadd.f32 1.0, %v654_v49 }
 0x2e9   :  { %v656_v37 = vpop.eup %655 }
 0x2ea   :  { %v84_v25 = vadd.f32 1.0, %v656_v37  ;;  %v658_v39 = vpop.eup %657  ;;  %659 = vlog2.f32 %v83_v38 }
 0x2eb   :  { %v85_v41 = vadd.f32 1.0, %v658_v39 }
 0x2ec   :  { %661 = vlog2.f32 %v84_v25 }
 0x2ed   :  { %663 = vlog2.f32 %v85_v41 }
 0x2f4   :  { %v660_v42 = vpop.eup %659 }
 0x2f5   :  { %v87_v54 = vmul.f32 0.6931472, %v660_v42 }
 0x2f6   :  { %v662_v45 = vpop.eup %661 }
 0x2f7   :  { %v89_v47 = vmul.f32 0.6931472, %v662_v45  ;;  %v664_v27 = vpop.eup %663  ;;  %v92_v50 = vadd.f32 %v87_v54, %v68_v61 }
 0x2f8   :  { %v91_v52 = vmul.f32 0.6931472, %v664_v27 }
 0x2f9   :  { %v93_v31 = vadd.f32 %v89_v47, %v69_v46 }
 0x2fa   :  { %v94_v56 = vadd.f32 %v91_v52, %v70_v55 }
 0x2fb   :  { %v95_v53 = vadd.f32 %v93_v31, %v92_v50 }
 0x2fd   :  { %v96_v57 = vadd.f32 %v95_v53, %v94_v56 }
 0x2ff   :  { %v97_v58 = vrot.slane %v96_v57, 4 }
 0x301   :  { %v98_v59 = vadd.f32 %v97_v58, %v96_v57 }
 0x303   :  { %v99_v60 = vrot.slane %v98_v59, 2 }
 0x305   :  { %v100_v62 = vadd.f32 %v99_v60, %v98_v59 }
 0x307   :  { %v101_v63 = vrot.slane %v100_v62, 1 }
 0x309   :  { %v102_v32 = vadd.f32 %v101_v63, %v100_v62 }
 0x30b   :  { %v103_v44 = vmul.f32 0.041666668, %v102_v32 }
 0x35a   :  { %v535_v0 = vpop.permute.xlu1 %534 }
 0x35b   :  { %v537_v40 = vsel %vm487_vm12, %v103_v44, %v535_v0 }
 0x35c   :  { %539 = vst.msk [vmem:[%s978_s7] sm:$0x1] %vm538_vm3, %v537_v40 }

</bundles_post_ra>
